<compile_context>
chip_gen: v7x
topology: tpu7x:2x2x1
jax: 0.10.0
libtpu: 0.0.40
codegen_flags: <defaults>
</compile_context>

<pallas_src>
import functools

import numpy as np
import jax
import jax.numpy as jnp
from jax.experimental import pallas as pl
from jax.experimental.pallas import tpu as pltpu

_EPS = 1e-5                      # nn.InstanceNorm2d default
_ACT_DTYPE = jnp.bfloat16        # inter-layer activation dtype


def _round_up(x, m):
    return (x + m - 1) // m * m


def _cdiv(a, b):
    return -(-a // b)


@functools.lru_cache(maxsize=None)
def _vmem_limit():
    """Scoped-VMEM limit derived from the chip (v7x only has 64 MiB)."""
    try:
        cap = int(pltpu.get_tpu_info().vmem_capacity_bytes)
    except Exception:
        cap = 64 * 1024 * 1024
    return min(cap * 3 // 4, 96 * 1024 * 1024)


def _phase_taps(kH, kW, stride):
    """Taps (ri, rj, qi, qj); kernel element = (stride*qi+ri, stride*qj+rj)."""
    taps = []
    for ri in range(stride):
        for rj in range(stride):
            for qi in range(_cdiv(kH - ri, stride)):
                for qj in range(_cdiv(kW - rj, stride)):
                    taps.append((ri, rj, qi, qj))
    return taps


def _pick_rows(Ho, Wrow, Cout, P=1, flatten=False, budget=256 * 1024):
    """Largest divisor of Ho keeping the per-step acc/output footprint small."""
    per_row = Wrow * Cout * (4 + 2 * P)
    cands = [d for d in range(1, Ho + 1) if Ho % d == 0]
    if flatten:                                   # lane-flattened output block
        cands = [d for d in cands if d % 8 == 0 or d == Ho] or [Ho]
    fits = [d for d in cands if d * per_row <= budget]
    return max(fits) if fits else min(cands)


def _pick_tile(total, cap=2048):
    cands = [d for d in range(1, total + 1)
             if total % d == 0 and d <= cap and (d % 8 == 0 or d == total)]
    return max(cands) if cands else total


# --------------------------- fused conv kernel ------------------------------
#
# The activation is a flattened pitched slab (row pitch Wrow, multiple of 8):
# element (phase, row, col) lives at flat index phase*slab + row*Wrow + col.
# For tap offset `off`, x[n, off + m, :] is exactly the input element needed
# by output flat position m; columns >= Wo of each output row are junk (row
# wrap-around) and are cropped in the (small, per-row-block) epilogue.

def _fused_conv_kernel(x_ref, w_ref, *out_refs, offsets, rows, Wrow, Wo,
                       act, flatten, stats):
    if stats:
        o_ref, s_ref, ss_ref = out_refs
    else:
        (o_ref,) = out_refs
    P = len(offsets)                               # output phases (1 for conv)
    cout = w_ref.shape[-1]
    M = rows * Wrow
    row0 = pl.multiple_of(pl.program_id(1) * M, 8)

    psum = jnp.zeros((cout,), jnp.float32)
    psq = jnp.zeros((cout,), jnp.float32)

    for p in range(P):                             # static unroll over phases
        acc = jnp.zeros((M, cout), jnp.float32)    # tile-sized accumulator
        for t, off in enumerate(offsets[p]):       # static unroll over taps
            a = x_ref[0, pl.ds(row0 + off, M), :]  # (M, K) bf16
            acc = acc + jnp.dot(a, w_ref[p, t],
                                preferred_element_type=jnp.float32)
        y = acc.reshape(rows, Wrow, cout)
        if Wo != Wrow:
            y = y[:, :Wo, :]                       # crop pitch-junk columns
        if stats:                                  # fused IN statistics (f32)
            psum = psum + jnp.sum(y, axis=(0, 1))
            psq = psq + jnp.sum(y * y, axis=(0, 1))
        if act == "tanh":
            y = jnp.tanh(y)                        # fused final activation
        if P == 1:
            if flatten:                            # lane-dense store (Cout=3)
                o_ref[0] = y.reshape(rows, Wo * cout).astype(o_ref.dtype)
            else:
                o_ref[0] = y.astype(o_ref.dtype)
        else:
            o_ref[0, p] = y.astype(o_ref.dtype)

    if stats:
        @pl.when(pl.program_id(1) == 0)
        def _():
            s_ref[...] = jnp.zeros(s_ref.shape, jnp.float32)
            ss_ref[...] = jnp.zeros(ss_ref.shape, jnp.float32)

        s_ref[...] += psum.reshape(1, 1, cout)
        ss_ref[...] += psq.reshape(1, 1, cout)


def _fused_conv(x_flat, w_packed, offsets, *, Ho, Wo, Wrow, rows, act=None,
                flatten=False, stats=False, out_dtype=_ACT_DTYPE):
    N, L, Cx = x_flat.shape
    P, T, Cxw, Cout = w_packed.shape
    assert Cx == Cxw and len(offsets) == P and all(len(o) == T for o in offsets)
    assert Ho % rows == 0
    nrb = Ho // rows

    kernel = functools.partial(
        _fused_conv_kernel, offsets=tuple(tuple(int(o) for o in ph) for ph in offsets),
        rows=rows, Wrow=Wrow, Wo=Wo, act=act, flatten=flatten, stats=stats)

    if P == 1:
        if flatten:
            out_shapes = [jax.ShapeDtypeStruct((N, Ho, Wo * Cout), out_dtype)]
            out_specs = [pl.BlockSpec((1, rows, Wo * Cout),
                                      lambda n, r: (n, r, 0))]
        else:
            out_shapes = [jax.ShapeDtypeStruct((N, Ho, Wo, Cout), out_dtype)]
            out_specs = [pl.BlockSpec((1, rows, Wo, Cout),
                                      lambda n, r: (n, r, 0, 0))]
    else:
        out_shapes = [jax.ShapeDtypeStruct((N, P, Ho, Wo, Cout), out_dtype)]
        out_specs = [pl.BlockSpec((1, P, rows, Wo, Cout),
                                  lambda n, r: (n, 0, r, 0, 0))]
    if stats:
        stat_shape = jax.ShapeDtypeStruct((N, 1, Cout), jnp.float32)
        stat_spec = pl.BlockSpec((1, 1, Cout), lambda n, r: (n, 0, 0))
        out_shapes += [stat_shape, stat_shape]
        out_specs += [stat_spec, stat_spec]

    res = pl.pallas_call(
        kernel,
        out_shape=tuple(out_shapes),
        grid=(N, nrb),
        in_specs=[pl.BlockSpec((1, L, Cx), lambda n, r: (n, 0, 0)),
                  pl.BlockSpec((P, T, Cx, Cout), lambda n, r: (0, 0, 0, 0))],
        out_specs=tuple(out_specs),
        compiler_params=pltpu.CompilerParams(
            dimension_semantics=("parallel",
                                 "arbitrary" if stats else "parallel"),
            vmem_limit_bytes=_vmem_limit()),
    )(x_flat, w_packed)
    return res if stats else res[0]


# ------------------------------ convolutions --------------------------------

def conv2d(x, layer, *, stats):
    """nn.Conv2d(..., bias=False); NHWC bf16 activations, packed bf16 weights."""
    N, H, W, Cin = x.shape
    k, s, p = layer["k"], layer["stride"], layer["pad"]
    Hp, Wp = H + 2 * p, W + 2 * p
    Ho, Wo = (Hp - k) // s + 1, (Wp - k) // s + 1
    Cout = layer["w_packed"].shape[-1]

    if layer["unfold_w"]:
        # kW unfolded into channels: taps over kH only, K = Cin*k (MXU-friendly)
        Wrow = _round_up(Wo, 8)
        xp = jnp.pad(x, ((0, 0), (p, p), (p, Wrow + k - 1 - W - p), (0, 0)))
        xu = jnp.concatenate([xp[:, :, j:j + Wrow, :] for j in range(k)],
                             axis=-1)
        x_flat = xu.reshape(N, Hp * Wrow, Cin * k)
        offsets = (tuple(qi * Wrow for qi in range(k)),)
    elif s == 1:
        Wrow = _round_up(Wp, 8)
        xp = jnp.pad(x, ((0, 0), (p, p + 1), (p, Wrow - W - p), (0, 0)))
        x_flat = xp.reshape(N, (Hp + 1) * Wrow, Cin)
        offsets = (tuple(qi * Wrow + qj
                         for qi in range(k) for qj in range(k)),)
    else:
        # input-phase decomposition for strided convs (no wasted MXU FLOPs)
        Hrow = max(_cdiv(Hp - r, s) for r in range(s))
        Wrow = _round_up(max(_cdiv(Wp - r, s) for r in range(s)), 8)
        slab = Hrow * Wrow
        xp = jnp.pad(x, ((0, 0), (p, p), (p, p), (0, 0)))
        slabs = []
        for ri in range(s):
            for rj in range(s):
                ph = xp[:, ri::s, rj::s, :]
                ph = jnp.pad(ph, ((0, 0), (0, Hrow - ph.shape[1]),
                                  (0, Wrow - ph.shape[2]), (0, 0)))
                slabs.append(ph.reshape(N, slab, Cin))
        slabs.append(jnp.zeros((N, Wrow, Cin), x.dtype))   # tail guard row
        x_flat = jnp.concatenate(slabs, axis=1)
        offsets = (tuple((ri * s + rj) * slab + qi * Wrow + qj
                         for (ri, rj, qi, qj) in _phase_taps(k, k, s)),)

    rows = _pick_rows(Ho, Wrow, Cout, P=1, flatten=layer["flatten"])
    res = _fused_conv(x_flat, layer["w_packed"], offsets, Ho=Ho, Wo=Wo,
                      Wrow=Wrow, rows=rows, act=layer["act"],
                      flatten=layer["flatten"], stats=stats,
                      out_dtype=layer["out_dtype"])
    if stats:
        y, ssum, ssq = res
    else:
        y = res
    if layer["flatten"]:
        y = y.reshape(N, Ho, Wo, Cout)
    return (y, ssum, ssq) if stats else y


def conv_transpose2d(x, layer):
    """nn.ConvTranspose2d(..., bias=False): all s^2 output phases in one call."""
    N, H, W, Cin = x.shape
    k, s, p = layer["k"], layer["stride"], layer["pad"]
    Hout, Wout = (H - 1) * s - 2 * p + k, (W - 1) * s - 2 * p + k
    assert Hout % s == 0 and Wout % s == 0
    Hop, Wop = Hout // s, Wout // s
    phases = layer["phases"]
    P, T = layer["w_packed"].shape[:2]
    Cout = layer["w_packed"].shape[-1]

    PT = max(max(0, ph["Qy"] - 1 - ph["qy"]) for ph in phases)
    PB = max(max(0, Hop - 1 + ph["qy"] - (H - 1)) for ph in phases)
    PL = max(max(0, ph["Qx"] - 1 - ph["qx"]) for ph in phases)
    PR = max(max(0, Wop - 1 + ph["qx"] - (W - 1)) for ph in phases)
    Hc, Wc = H + PT + PB, W + PL + PR
    Wrow = _round_up(Wc, 8)
    xp = jnp.pad(x, ((0, 0), (PT, PB + 1), (PL, PR + Wrow - Wc), (0, 0)))
    x_flat = xp.reshape(N, (Hc + 1) * Wrow, Cin)

    offsets = []
    for ph in phases:
        r0 = PT - (ph["Qy"] - 1) + ph["qy"]
        c0 = PL - (ph["Qx"] - 1) + ph["qx"]
        offs = [(ey + r0) * Wrow + (ex + c0)
                for ey in range(ph["Qy"]) for ex in range(ph["Qx"])]
        offs += [0] * (T - len(offs))              # padded taps have zero weights
        offsets.append(tuple(offs))

    rows = _pick_rows(Hop, Wrow, Cout, P=P, flatten=False)
    y, ssum, ssq = _fused_conv(x_flat, layer["w_packed"], tuple(offsets),
                               Ho=Hop, Wo=Wop, Wrow=Wrow, rows=rows, stats=True)
    out = (y.reshape(N, s, s, Hop, Wop, Cout)
             .transpose(0, 3, 1, 4, 2, 5).reshape(N, Hout, Wout, Cout))
    return out, ssum, ssq


# -------------------------- instance normalization --------------------------
# Statistics are produced by the conv epilogue; only the apply pass remains.

def _in_apply_kernel(x_ref, s_ref, ss_ref, g_ref, b_ref, *rest,
                     count, eps, relu):
    *maybe_res, o_ref = rest
    x = x_ref[0].astype(jnp.float32)               # (tile, C)
    inv = 1.0 / count
    mean = s_ref[0] * inv                          # (1, C)
    var = jnp.maximum(ss_ref[0] * inv - mean * mean, 0.0)
    scale = g_ref[0] * jax.lax.rsqrt(var + eps)
    shift = b_ref[0] - mean * scale
    y = x * scale + shift
    if relu:
        y = jnp.maximum(y, 0.0)
    if maybe_res:
        y = y + maybe_res[0][0].astype(jnp.float32)  # fused residual skip
    o_ref[0] = y.astype(o_ref.dtype)


def instance_norm_apply(x, ssum, ssq, gamma, beta, *, relu, residual=None):
    """Affine instance norm (+ReLU / +residual) from precomputed f32 sums."""
    N, H, W, C = x.shape
    HW = H * W
    xf = x.reshape(N, HW, C)
    tile = _pick_tile(HW)
    nblk = HW // tile
    chunk_spec = pl.BlockSpec((1, tile, C), lambda n, j: (n, j, 0))
    stat_spec = pl.BlockSpec((1, 1, C), lambda n, j: (n, 0, 0))
    param_spec = pl.BlockSpec((1, 1, C), lambda n, j: (0, 0, 0))

    inputs = [xf, ssum, ssq, gamma, beta]
    in_specs = [chunk_spec, stat_spec, stat_spec, param_spec, param_spec]
    if residual is not None:
        inputs.append(residual.reshape(N, HW, C))
        in_specs.append(chunk_spec)

    kernel = functools.partial(_in_apply_kernel, count=float(HW), eps=_EPS,
                               relu=relu)
    out = pl.pallas_call(
        kernel,
        out_shape=jax.ShapeDtypeStruct((N, HW, C), x.dtype),
        grid=(N, nblk),
        in_specs=in_specs,
        out_specs=chunk_spec,
        compiler_params=pltpu.CompilerParams(
            dimension_semantics=("parallel", "parallel"),
            vmem_limit_bytes=_vmem_limit()),
    )(*inputs)
    return out.reshape(N, H, W, C)


# ------------------------- parameter initialization -------------------------

def _in_params(key, c):
    k1, k2 = jax.random.split(key)
    gamma = (1.0 + 0.1 * jax.random.normal(k1, (c,), jnp.float32)).reshape(1, 1, c)
    beta = (0.1 * jax.random.normal(k2, (c,), jnp.float32)).reshape(1, 1, c)
    return gamma, beta


def _pack_conv_weight(w, k, stride):
    """(Cout,Cin,kH,kW) -> (1, T, Cin, Cout); tap order matches _phase_taps."""
    mats = [jnp.transpose(w[:, :, stride * qi + ri, stride * qj + rj], (1, 0))
            for (ri, rj, qi, qj) in _phase_taps(k, k, stride)]
    return jnp.stack(mats)[None].astype(_ACT_DTYPE)


def _pack_conv_weight_unfold(w, k):
    """(Cout,Cin,kH,kW) -> (1, kH, Cin*kW, Cout); channel index = j*Cin + c."""
    cout = w.shape[0]
    mats = [jnp.transpose(w[:, :, qi, :], (2, 1, 0)).reshape(-1, cout)
            for qi in range(k)]
    return jnp.stack(mats)[None].astype(_ACT_DTYPE)


def _make_conv(key, cout, cin, k, stride, pad, act=None, out_dtype=_ACT_DTYPE,
               flatten=False):
    w = jax.random.normal(key, (cout, cin, k, k), jnp.float32) / np.sqrt(cin * k * k)
    unfold = (stride == 1 and cin * k <= 128)      # raise MXU K on small-Cin convs
    packed = (_pack_conv_weight_unfold(w, k) if unfold
              else _pack_conv_weight(w, k, stride))
    return dict(k=k, stride=stride, pad=pad, act=act, out_dtype=out_dtype,
                flatten=flatten, unfold_w=unfold, w_raw=w, w_packed=packed)


def _make_convT(key, cin, cout, k, stride, pad):
    """nn.ConvTranspose2d weight (Cin,Cout,kH,kW) -> per-output-phase sub-kernels."""
    w = jax.random.normal(key, (cin, cout, k, k), jnp.float32) / np.sqrt(cin * k * k)
    tmp = []
    T = 0
    for py in range(stride):
        ty = py + pad
        ry, qy = ty % stride, ty // stride
        Qy = _cdiv(k - ry, stride)
        for px in range(stride):
            tx = px + pad
            rx, qx = tx % stride, tx // stride
            Qx = _cdiv(k - rx, stride)
            mats = [w[:, :, stride * (Qy - 1 - ey) + ry, stride * (Qx - 1 - ex) + rx]
                    for ey in range(Qy) for ex in range(Qx)]
            tmp.append((dict(qy=qy, Qy=Qy, qx=qx, Qx=Qx), mats))
            T = max(T, len(mats))
    phases, w_stack = [], []
    for meta, mats in tmp:
        mats = mats + [jnp.zeros_like(mats[0])] * (T - len(mats))
        phases.append(meta)
        w_stack.append(jnp.stack(mats))
    return dict(k=k, stride=stride, pad=pad, phases=phases, w_raw=w,
                w_packed=jnp.stack(w_stack).astype(_ACT_DTYPE))


def init_generator(key, conv_dim=64, c_dim=5, repeat_num=6):
    keys = iter(jax.random.split(key, 4 * repeat_num + 20))
    layers = []

    g, b = _in_params(next(keys), conv_dim)
    layers.append(dict(kind="conv_in",
                       conv=_make_conv(next(keys), conv_dim, 3 + c_dim, 7, 1, 3),
                       gamma=g, beta=b))
    curr = conv_dim
    for _ in range(2):                             # down-sampling
        g, b = _in_params(next(keys), curr * 2)
        layers.append(dict(kind="conv_in",
                           conv=_make_conv(next(keys), curr * 2, curr, 4, 2, 1),
                           gamma=g, beta=b))
        curr *= 2
    for _ in range(repeat_num):                    # bottleneck residual blocks
        c1 = _make_conv(next(keys), curr, curr, 3, 1, 1)
        g1, b1 = _in_params(next(keys), curr)
        c2 = _make_conv(next(keys), curr, curr, 3, 1, 1)
        g2, b2 = _in_params(next(keys), curr)
        layers.append(dict(kind="res", conv1=c1, g1=g1, b1=b1,
                           conv2=c2, g2=g2, b2=b2))
    for _ in range(2):                             # up-sampling
        g, b = _in_params(next(keys), curr // 2)
        layers.append(dict(kind="convT_in",
                           conv=_make_convT(next(keys), curr, curr // 2, 4, 2, 1),
                           gamma=g, beta=b))
        curr //= 2
    layers.append(dict(kind="conv_out",
                       conv=_make_conv(next(keys), 3, curr, 7, 1, 3, act="tanh",
                                       out_dtype=jnp.float32, flatten=True)))
    return layers


# --------------------------------- forward ----------------------------------

def generator_forward(layers, x_nchw, c):
    """x_nchw: (N,3,H,W) f32, c: (N,c_dim) f32 -> (N,3,H,W) f32."""
    N, _, H, W = x_nchw.shape
    cmap = jnp.broadcast_to(c.astype(jnp.float32)[:, :, None, None],
                            (N, c.shape[1], H, W))
    x = jnp.concatenate([x_nchw.astype(jnp.float32), cmap], axis=1)
    h = jnp.transpose(x, (0, 2, 3, 1)).astype(_ACT_DTYPE)             # NHWC bf16
    for layer in layers:
        kind = layer["kind"]
        if kind == "conv_in":
            y, s, ss = conv2d(h, layer["conv"], stats=True)
            h = instance_norm_apply(y, s, ss, layer["gamma"], layer["beta"],
                                    relu=True)
        elif kind == "res":
            r = h
            y, s, ss = conv2d(h, layer["conv1"], stats=True)
            t = instance_norm_apply(y, s, ss, layer["g1"], layer["b1"], relu=True)
            y, s, ss = conv2d(t, layer["conv2"], stats=True)
            h = instance_norm_apply(y, s, ss, layer["g2"], layer["b2"],
                                    relu=False, residual=r)
        elif kind == "convT_in":
            y, s, ss = conv_transpose2d(h, layer["conv"])
            h = instance_norm_apply(y, s, ss, layer["gamma"], layer["beta"],
                                    relu=True)
        elif kind == "conv_out":
            h = conv2d(h, layer["conv"], stats=False)
        else:
            raise ValueError(kind)
    return jnp.transpose(h, (0, 3, 1, 2))                             # -> NCHW


# ------------------------ pure-JAX reference (testing) -----------------------

def _ref_forward(layers, x_nchw, c):
    """Mirror of the Pallas numerics (bf16 operands, f32 accum / statistics)."""
    N, _, H, W = x_nchw.shape
    cmap = jnp.broadcast_to(c.astype(jnp.float32)[:, :, None, None],
                            (N, c.shape[1], H, W))
    x = jnp.concatenate([x_nchw.astype(jnp.float32), cmap], axis=1)
    h = jnp.transpose(x, (0, 2, 3, 1)).astype(_ACT_DTYPE)

    def conv(h, lyr):
        w = jnp.transpose(lyr["w_raw"], (2, 3, 1, 0)).astype(_ACT_DTYPE)
        return jax.lax.conv_general_dilated(
            h, w, (lyr["stride"],) * 2, [(lyr["pad"], lyr["pad"])] * 2,
            dimension_numbers=("NHWC", "HWIO", "NHWC"),
            preferred_element_type=jnp.float32)

    def convT(h, lyr):
        k, s, p = lyr["k"], lyr["stride"], lyr["pad"]
        w = jnp.transpose(lyr["w_raw"][:, :, ::-1, ::-1],
                          (2, 3, 0, 1)).astype(_ACT_DTYPE)
        return jax.lax.conv_general_dilated(
            h, w, (1, 1), [(k - 1 - p, k - 1 - p)] * 2, lhs_dilation=(s, s),
            dimension_numbers=("NHWC", "HWIO", "NHWC"),
            preferred_element_type=jnp.float32)

    def inorm(y32, gamma, beta, relu, residual=None):
        yb = y32.astype(_ACT_DTYPE).astype(jnp.float32)
        mean = jnp.mean(y32, axis=(1, 2), keepdims=True)
        var = jnp.maximum(jnp.mean(y32 * y32, axis=(1, 2), keepdims=True)
                          - mean * mean, 0.0)
        scale = gamma.reshape(1, 1, 1, -1) * jax.lax.rsqrt(var + _EPS)
        shift = beta.reshape(1, 1, 1, -1) - mean * scale
        out = yb * scale + shift
        if relu:
            out = jnp.maximum(out, 0.0)
        if residual is not None:
            out = out + residual.astype(jnp.float32)
        return out.astype(_ACT_DTYPE)

    for layer in layers:
        kind = layer["kind"]
        if kind == "conv_in":
            h = inorm(conv(h, layer["conv"]), layer["gamma"], layer["beta"], True)
        elif kind == "res":
            r = h
            t = inorm(conv(h, layer["conv1"]), layer["g1"], layer["b1"], True)
            h = inorm(conv(t, layer["conv2"]), layer["g2"], layer["b2"], False,
                      residual=r)
        elif kind == "convT_in":
            h = inorm(convT(h, layer["conv"]), layer["gamma"], layer["beta"], True)
        elif kind == "conv_out":
            h = jnp.tanh(conv(h, layer["conv"]))
    return jnp.transpose(h, (0, 3, 1, 2))


# ----------------------------------- main ------------------------------------

if __name__ == "__main__":
    key = jax.random.PRNGKey(0)
    kp, kx, kc = jax.random.split(key, 3)

    # small but structure-preserving configuration
    conv_dim, c_dim, repeat_num = 8, 5, 2
    N, H, W = 2, 16, 16

    layers = init_generator(kp, conv_dim=conv_dim, c_dim=c_dim,
                            repeat_num=repeat_num)
    x = jax.random.normal(kx, (N, 3, H, W), jnp.float32)
    c = jax.random.uniform(kc, (N, c_dim), jnp.float32)

    out = jax.block_until_ready(generator_forward(layers, x, c))
    ref = jax.block_until_ready(_ref_forward(layers, x, c))

    assert out.shape == (N, 3, H, W), out.shape
    assert bool(jnp.all(jnp.isfinite(out)))
    err = float(jnp.max(jnp.abs(out - ref)))
    assert err < 2e-2, f"max abs error vs reference: {err}"
    print("KERNEL_OK")
</pallas_src>

<mosaic_0001>
module attributes {stable_mosaic.version = 11 : i64} {
  func.func @_fused_conv_kernel(%arg0: i32, %arg1: i32, %arg2: memref<1x352x56xbf16, #tpu.memory_space<vmem>>, %arg3: memref<1x7x56x8xbf16, #tpu.memory_space<vmem>>, %arg4: memref<1x16x16x8xbf16, #tpu.memory_space<vmem>>, %arg5: memref<1x1x8xf32, #tpu.memory_space<vmem>>, %arg6: memref<1x1x8xf32, #tpu.memory_space<vmem>>) attributes {dimension_semantics = [#tpu.dimension_semantics<parallel>, #tpu.dimension_semantics<arbitrary>], iteration_bounds = array<i64: 2, 1>, scalar_prefetch = 0 : i64, scratch_operands = 0 : i64, tpu.core_type = #tpu.core_type<tc>, window_params = [{transform_indices = @transform_0, window_bounds = array<i64: 1, 352, 56>}, {pipeline_mode = #tpu.pipeline_mode<synchronous>, transform_indices = @transform_1, window_bounds = array<i64: 1, 7, 56, 8>}, {transform_indices = @transform_2, window_bounds = array<i64: 1, 16, 16, 8>}, {transform_indices = @transform_3, window_bounds = array<i64: 1, 1, 8>}, {transform_indices = @transform_4, window_bounds = array<i64: 1, 1, 8>}]} {
    %c256_i32 = arith.constant 256 : i32
    %0 = arith.muli %arg1, %c256_i32 : i32
    %1 = tpu.assume_multiple %0, 8 : i32
    %cst = arith.constant 0.000000e+00 : f32
    %2 = vector.broadcast %cst : f32 to vector<8xf32>
    %cst_0 = arith.constant 0.000000e+00 : f32
    %3 = vector.broadcast %cst_0 : f32 to vector<8xf32>
    %cst_1 = arith.constant 0.000000e+00 : f32
    %4 = vector.broadcast %cst_1 : f32 to vector<256x8xf32>
    %c0_i32 = arith.constant 0 : i32
    %5 = arith.addi %1, %c0_i32 : i32
    %c0 = arith.constant 0 : index
    %6 = arith.index_cast %5 : i32 to index
    %c0_2 = arith.constant 0 : index
    %7 = vector.load %arg2[%c0, %6, %c0_2] : memref<1x352x56xbf16, #tpu.memory_space<vmem>>, vector<1x256x56xbf16>
    %8 = vector.shape_cast %7 : vector<1x256x56xbf16> to vector<256x56xbf16>
    %c0_3 = arith.constant 0 : index
    %c0_4 = arith.constant 0 : index
    %c0_5 = arith.constant 0 : index
    %c0_6 = arith.constant 0 : index
    %9 = vector.load %arg3[%c0_3, %c0_4, %c0_5, %c0_6] : memref<1x7x56x8xbf16, #tpu.memory_space<vmem>>, vector<1x1x56x8xbf16>
    %10 = vector.shape_cast %9 : vector<1x1x56x8xbf16> to vector<56x8xbf16>
    %cst_7 = arith.constant dense<0.000000e+00> : vector<256x8xf32>
    %11 = tpu.matmul %8, %10, %cst_7 {dimension_numbers = #tpu.dot_dimension_numbers<[1], [0], [0], [1], [0, 0, 1, 1], [], []>} : vector<256x56xbf16>, vector<56x8xbf16>, vector<256x8xf32> -> vector<256x8xf32>
    %12 = arith.addf %4, %11 : vector<256x8xf32>
    %c16_i32 = arith.constant 16 : i32
    %13 = arith.addi %1, %c16_i32 : i32
    %c0_8 = arith.constant 0 : index
    %14 = arith.index_cast %13 : i32 to index
    %c0_9 = arith.constant 0 : index
    %15 = vector.load %arg2[%c0_8, %14, %c0_9] : memref<1x352x56xbf16, #tpu.memory_space<vmem>>, vector<1x256x56xbf16>
    %16 = vector.shape_cast %15 : vector<1x256x56xbf16> to vector<256x56xbf16>
    %c0_10 = arith.constant 0 : index
    %c1 = arith.constant 1 : index
    %c0_11 = arith.constant 0 : index
    %c0_12 = arith.constant 0 : index
    %17 = vector.load %arg3[%c0_10, %c1, %c0_11, %c0_12] : memref<1x7x56x8xbf16, #tpu.memory_space<vmem>>, vector<1x1x56x8xbf16>
    %18 = vector.shape_cast %17 : vector<1x1x56x8xbf16> to vector<56x8xbf16>
    %cst_13 = arith.constant dense<0.000000e+00> : vector<256x8xf32>
    %19 = tpu.matmul %16, %18, %cst_13 {dimension_numbers = #tpu.dot_dimension_numbers<[1], [0], [0], [1], [0, 0, 1, 1], [], []>} : vector<256x56xbf16>, vector<56x8xbf16>, vector<256x8xf32> -> vector<256x8xf32>
    %20 = arith.addf %12, %19 : vector<256x8xf32>
    %c32_i32 = arith.constant 32 : i32
    %21 = arith.addi %1, %c32_i32 : i32
    %c0_14 = arith.constant 0 : index
    %22 = arith.index_cast %21 : i32 to index
    %c0_15 = arith.constant 0 : index
    %23 = vector.load %arg2[%c0_14, %22, %c0_15] : memref<1x352x56xbf16, #tpu.memory_space<vmem>>, vector<1x256x56xbf16>
    %24 = vector.shape_cast %23 : vector<1x256x56xbf16> to vector<256x56xbf16>
    %c0_16 = arith.constant 0 : index
    %c2 = arith.constant 2 : index
    %c0_17 = arith.constant 0 : index
    %c0_18 = arith.constant 0 : index
    %25 = vector.load %arg3[%c0_16, %c2, %c0_17, %c0_18] : memref<1x7x56x8xbf16, #tpu.memory_space<vmem>>, vector<1x1x56x8xbf16>
    %26 = vector.shape_cast %25 : vector<1x1x56x8xbf16> to vector<56x8xbf16>
    %cst_19 = arith.constant dense<0.000000e+00> : vector<256x8xf32>
    %27 = tpu.matmul %24, %26, %cst_19 {dimension_numbers = #tpu.dot_dimension_numbers<[1], [0], [0], [1], [0, 0, 1, 1], [], []>} : vector<256x56xbf16>, vector<56x8xbf16>, vector<256x8xf32> -> vector<256x8xf32>
    %28 = arith.addf %20, %27 : vector<256x8xf32>
    %c48_i32 = arith.constant 48 : i32
    %29 = arith.addi %1, %c48_i32 : i32
    %c0_20 = arith.constant 0 : index
    %30 = arith.index_cast %29 : i32 to index
    %c0_21 = arith.constant 0 : index
    %31 = vector.load %arg2[%c0_20, %30, %c0_21] : memref<1x352x56xbf16, #tpu.memory_space<vmem>>, vector<1x256x56xbf16>
    %32 = vector.shape_cast %31 : vector<1x256x56xbf16> to vector<256x56xbf16>
    %c0_22 = arith.constant 0 : index
    %c3 = arith.constant 3 : index
    %c0_23 = arith.constant 0 : index
    %c0_24 = arith.constant 0 : index
    %33 = vector.load %arg3[%c0_22, %c3, %c0_23, %c0_24] : memref<1x7x56x8xbf16, #tpu.memory_space<vmem>>, vector<1x1x56x8xbf16>
    %34 = vector.shape_cast %33 : vector<1x1x56x8xbf16> to vector<56x8xbf16>
    %cst_25 = arith.constant dense<0.000000e+00> : vector<256x8xf32>
    %35 = tpu.matmul %32, %34, %cst_25 {dimension_numbers = #tpu.dot_dimension_numbers<[1], [0], [0], [1], [0, 0, 1, 1], [], []>} : vector<256x56xbf16>, vector<56x8xbf16>, vector<256x8xf32> -> vector<256x8xf32>
    %36 = arith.addf %28, %35 : vector<256x8xf32>
    %c64_i32 = arith.constant 64 : i32
    %37 = arith.addi %1, %c64_i32 : i32
    %c0_26 = arith.constant 0 : index
    %38 = arith.index_cast %37 : i32 to index
    %c0_27 = arith.constant 0 : index
    %39 = vector.load %arg2[%c0_26, %38, %c0_27] : memref<1x352x56xbf16, #tpu.memory_space<vmem>>, vector<1x256x56xbf16>
    %40 = vector.shape_cast %39 : vector<1x256x56xbf16> to vector<256x56xbf16>
    %c0_28 = arith.constant 0 : index
    %c4 = arith.constant 4 : index
    %c0_29 = arith.constant 0 : index
    %c0_30 = arith.constant 0 : index
    %41 = vector.load %arg3[%c0_28, %c4, %c0_29, %c0_30] : memref<1x7x56x8xbf16, #tpu.memory_space<vmem>>, vector<1x1x56x8xbf16>
    %42 = vector.shape_cast %41 : vector<1x1x56x8xbf16> to vector<56x8xbf16>
    %cst_31 = arith.constant dense<0.000000e+00> : vector<256x8xf32>
    %43 = tpu.matmul %40, %42, %cst_31 {dimension_numbers = #tpu.dot_dimension_numbers<[1], [0], [0], [1], [0, 0, 1, 1], [], []>} : vector<256x56xbf16>, vector<56x8xbf16>, vector<256x8xf32> -> vector<256x8xf32>
    %44 = arith.addf %36, %43 : vector<256x8xf32>
    %c80_i32 = arith.constant 80 : i32
    %45 = arith.addi %1, %c80_i32 : i32
    %c0_32 = arith.constant 0 : index
    %46 = arith.index_cast %45 : i32 to index
    %c0_33 = arith.constant 0 : index
    %47 = vector.load %arg2[%c0_32, %46, %c0_33] : memref<1x352x56xbf16, #tpu.memory_space<vmem>>, vector<1x256x56xbf16>
    %48 = vector.shape_cast %47 : vector<1x256x56xbf16> to vector<256x56xbf16>
    %c0_34 = arith.constant 0 : index
    %c5 = arith.constant 5 : index
    %c0_35 = arith.constant 0 : index
    %c0_36 = arith.constant 0 : index
    %49 = vector.load %arg3[%c0_34, %c5, %c0_35, %c0_36] : memref<1x7x56x8xbf16, #tpu.memory_space<vmem>>, vector<1x1x56x8xbf16>
    %50 = vector.shape_cast %49 : vector<1x1x56x8xbf16> to vector<56x8xbf16>
    %cst_37 = arith.constant dense<0.000000e+00> : vector<256x8xf32>
    %51 = tpu.matmul %48, %50, %cst_37 {dimension_numbers = #tpu.dot_dimension_numbers<[1], [0], [0], [1], [0, 0, 1, 1], [], []>} : vector<256x56xbf16>, vector<56x8xbf16>, vector<256x8xf32> -> vector<256x8xf32>
    %52 = arith.addf %44, %51 : vector<256x8xf32>
    %c96_i32 = arith.constant 96 : i32
    %53 = arith.addi %1, %c96_i32 : i32
    %c0_38 = arith.constant 0 : index
    %54 = arith.index_cast %53 : i32 to index
    %c0_39 = arith.constant 0 : index
    %55 = vector.load %arg2[%c0_38, %54, %c0_39] : memref<1x352x56xbf16, #tpu.memory_space<vmem>>, vector<1x256x56xbf16>
    %56 = vector.shape_cast %55 : vector<1x256x56xbf16> to vector<256x56xbf16>
    %c0_40 = arith.constant 0 : index
    %c6 = arith.constant 6 : index
    %c0_41 = arith.constant 0 : index
    %c0_42 = arith.constant 0 : index
    %57 = vector.load %arg3[%c0_40, %c6, %c0_41, %c0_42] : memref<1x7x56x8xbf16, #tpu.memory_space<vmem>>, vector<1x1x56x8xbf16>
    %58 = vector.shape_cast %57 : vector<1x1x56x8xbf16> to vector<56x8xbf16>
    %cst_43 = arith.constant dense<0.000000e+00> : vector<256x8xf32>
    %59 = tpu.matmul %56, %58, %cst_43 {dimension_numbers = #tpu.dot_dimension_numbers<[1], [0], [0], [1], [0, 0, 1, 1], [], []>} : vector<256x56xbf16>, vector<56x8xbf16>, vector<256x8xf32> -> vector<256x8xf32>
    %60 = arith.addf %52, %59 : vector<256x8xf32>
    %61 = vector.shape_cast %60 : vector<256x8xf32> to vector<16x16x8xf32>
    %cst_44 = arith.constant dense<0.000000e+00> : vector<8xf32>
    %62 = vector.multi_reduction <add>, %61, %cst_44 [0, 1] : vector<16x16x8xf32> to vector<8xf32>
    %63 = arith.addf %2, %62 : vector<8xf32>
    %64 = arith.mulf %61, %61 : vector<16x16x8xf32>
    %cst_45 = arith.constant dense<0.000000e+00> : vector<8xf32>
    %65 = vector.multi_reduction <add>, %64, %cst_45 [0, 1] : vector<16x16x8xf32> to vector<8xf32>
    %66 = arith.addf %3, %65 : vector<8xf32>
    %67 = arith.truncf %61 : vector<16x16x8xf32> to vector<16x16x8xbf16>
    %c0_46 = arith.constant 0 : index
    %c0_47 = arith.constant 0 : index
    %c0_48 = arith.constant 0 : index
    %c0_49 = arith.constant 0 : index
    %68 = vector.load %arg4[%c0_46, %c0_47, %c0_48, %c0_49] : memref<1x16x16x8xbf16, #tpu.memory_space<vmem>>, vector<1x16x16x8xbf16>
    %69 = vector.shape_cast %68 : vector<1x16x16x8xbf16> to vector<16x16x8xbf16>
    %70 = vector.shape_cast %67 : vector<16x16x8xbf16> to vector<1x16x16x8xbf16>
    tpu.vector_store %arg4[%c0_46, %c0_47, %c0_48, %c0_49], %70 {strides = array<i32>} : memref<1x16x16x8xbf16, #tpu.memory_space<vmem>>, vector<1x16x16x8xbf16>,
    %c0_i32_50 = arith.constant 0 : i32
    %71 = arith.cmpi eq, %arg1, %c0_i32_50 : i32
    %72 = arith.extui %71 : i1 to i32
    %c0_i32_51 = arith.constant 0 : i32
    %73 = arith.cmpi ne, %72, %c0_i32_51 : i32
    scf.if %73 {
      %cst_64 = arith.constant 0.000000e+00 : f32
      %82 = vector.broadcast %cst_64 : f32 to vector<1x1x8xf32>
      %c0_65 = arith.constant 0 : index
      %c0_66 = arith.constant 0 : index
      %c0_67 = arith.constant 0 : index
      %83 = vector.load %arg5[%c0_65, %c0_66, %c0_67] : memref<1x1x8xf32, #tpu.memory_space<vmem>>, vector<1x1x8xf32>
      tpu.vector_store %arg5[%c0_65, %c0_66, %c0_67], %82 {strides = array<i32>} : memref<1x1x8xf32, #tpu.memory_space<vmem>>, vector<1x1x8xf32>,
      %cst_68 = arith.constant 0.000000e+00 : f32
      %84 = vector.broadcast %cst_68 : f32 to vector<1x1x8xf32>
      %c0_69 = arith.constant 0 : index
      %c0_70 = arith.constant 0 : index
      %c0_71 = arith.constant 0 : index
      %85 = vector.load %arg6[%c0_69, %c0_70, %c0_71] : memref<1x1x8xf32, #tpu.memory_space<vmem>>, vector<1x1x8xf32>
      tpu.vector_store %arg6[%c0_69, %c0_70, %c0_71], %84 {strides = array<i32>} : memref<1x1x8xf32, #tpu.memory_space<vmem>>, vector<1x1x8xf32>,
    } else {
    }
    %c0_52 = arith.constant 0 : index
    %c0_53 = arith.constant 0 : index
    %c0_54 = arith.constant 0 : index
    %74 = vector.load %arg5[%c0_52, %c0_53, %c0_54] : memref<1x1x8xf32, #tpu.memory_space<vmem>>, vector<1x1x8xf32>
    %75 = vector.shape_cast %63 : vector<8xf32> to vector<1x1x8xf32>
    %76 = arith.addf %74, %75 : vector<1x1x8xf32>
    %c0_55 = arith.constant 0 : index
    %c0_56 = arith.constant 0 : index
    %c0_57 = arith.constant 0 : index
    %77 = vector.load %arg5[%c0_55, %c0_56, %c0_57] : memref<1x1x8xf32, #tpu.memory_space<vmem>>, vector<1x1x8xf32>
    tpu.vector_store %arg5[%c0_55, %c0_56, %c0_57], %76 {strides = array<i32>} : memref<1x1x8xf32, #tpu.memory_space<vmem>>, vector<1x1x8xf32>,
    %c0_58 = arith.constant 0 : index
    %c0_59 = arith.constant 0 : index
    %c0_60 = arith.constant 0 : index
    %78 = vector.load %arg6[%c0_58, %c0_59, %c0_60] : memref<1x1x8xf32, #tpu.memory_space<vmem>>, vector<1x1x8xf32>
    %79 = vector.shape_cast %66 : vector<8xf32> to vector<1x1x8xf32>
    %80 = arith.addf %78, %79 : vector<1x1x8xf32>
    %c0_61 = arith.constant 0 : index
    %c0_62 = arith.constant 0 : index
    %c0_63 = arith.constant 0 : index
    %81 = vector.load %arg6[%c0_61, %c0_62, %c0_63] : memref<1x1x8xf32, #tpu.memory_space<vmem>>, vector<1x1x8xf32>
    tpu.vector_store %arg6[%c0_61, %c0_62, %c0_63], %80 {strides = array<i32>} : memref<1x1x8xf32, #tpu.memory_space<vmem>>, vector<1x1x8xf32>,
    return
  }
  func.func @transform_0(%arg0: i32, %arg1: i32) -> (i32, i32, i32) {
    %c0_i32 = arith.constant 0 : i32
    %c0_i32_0 = arith.constant 0 : i32
    %c0_i32_1 = arith.constant 0 : i32
    return %arg0, %c0_i32, %c0_i32_0 : i32, i32, i32
  }
  func.func @transform_1(%arg0: i32, %arg1: i32) -> (i32, i32, i32, i32) {
    %c0_i32 = arith.constant 0 : i32
    %c0_i32_0 = arith.constant 0 : i32
    %c0_i32_1 = arith.constant 0 : i32
    %c0_i32_2 = arith.constant 0 : i32
    %c0_i32_3 = arith.constant 0 : i32
    return %c0_i32, %c0_i32_0, %c0_i32_1, %c0_i32_2 : i32, i32, i32, i32
  }
  func.func @transform_2(%arg0: i32, %arg1: i32) -> (i32, i32, i32, i32) {
    %c0_i32 = arith.constant 0 : i32
    %c0_i32_0 = arith.constant 0 : i32
    %c0_i32_1 = arith.constant 0 : i32
    return %arg0, %arg1, %c0_i32, %c0_i32_0 : i32, i32, i32, i32
  }
  func.func @transform_3(%arg0: i32, %arg1: i32) -> (i32, i32, i32) {
    %c0_i32 = arith.constant 0 : i32
    %c0_i32_0 = arith.constant 0 : i32
    %c0_i32_1 = arith.constant 0 : i32
    return %arg0, %c0_i32, %c0_i32_0 : i32, i32, i32
  }
  func.func @transform_4(%arg0: i32, %arg1: i32) -> (i32, i32, i32) {
    %c0_i32 = arith.constant 0 : i32
    %c0_i32_0 = arith.constant 0 : i32
    %c0_i32_1 = arith.constant 0 : i32
    return %arg0, %c0_i32, %c0_i32_0 : i32, i32, i32
  }
}

</mosaic_0001>

<bundles_post_ra>
// kernel: tpu_custom_call.1
= control target key start
LH: loop header
LB: loop body
LE: loop exit
PB: predicated region body
PF: predicated region fallthrough
CT: control target
= control target key end

     0   :  { %10 = vsyncpa [#allocation3], 0  ;;  %s5657_s0 = inlined_call_operand.vmem [shape: bf16[2,352,56], index: 0, kind: input, shape index: {}]   ;;  %s5658_s1 = inlined_call_operand.vmem [shape: bf16[1,7,56,8], index: 1, kind: input, shape index: {}]   ;;  %s5659_s2 = inlined_call_operand.vmem [shape: bf16[2,16,16,8], index: 2, kind: output, shape index: {0}]   ;;  %s5660_s3 = inlined_call_operand.hbm [shape: f32[2,1,8], index: 3, kind: output, shape index: {1}]   ;;  %s5661_s4 = inlined_call_operand.hbm [shape: f32[2,1,8], index: 4, kind: output, shape index: {2}]  }
   0x1   :  { %12 = vsyncpa [#allocation3 + $0x1], 0 }
   0x2   :  { %13 = vsyncpa [#allocation5], 0 }
   0x3   :  { %15 = vsyncpa [#allocation5 + $0x1], 0  ;;  %s4982_s15 = smov 0   ;;  %s4984_s16 = smov 0  }
   0x4   :  { %s4986_s17 = smov 0   ;;  %s4988_s18 = smov 0  }
   0x5   :  { %s4990_s19 = smov 0   ;;  %s4992_s20 = smov 0  }
   0x6 LB: > { %s3449_s21 = sadd.s32 4294967295, %s4952_s20   ;;  %s3450_s22 = sadd.s32 4294967294, %s4952_s20   ;;  %s4952_s20 = sphi %s4992_s20, %s21_s20   ;;  %s4948_s19 = sphi %s4990_s19, %s5668_s19   ;;  %s4944_s18 = sphi %s4988_s18, %s5667_s18   ;;  %s4940_s17 = sphi %s4986_s17, %s5666_s17   ;;  %s4936_s16 = sphi %s4984_s16, %s5665_s16   ;;  %s4932_s15 = sphi %s4982_s15, %s5664_s15  }
   0x7   : > { %s33_s23 = sadd.s32 1, %s4948_s19  ;;  %s115_s24 = sadd.s32 1, %s4940_s17 }
   0x8   : > { %p35_p0 = scmp.ge.s32.totalorder %s33_s23, 2  ;;  %p125_p1 = scmp.ne.s32.totalorder %s4940_s17, %s4936_s16 }
   0x9   : > { %p126_p2 = scmp.eq.s32.totalorder %s3449_s21, 1  ;;  %p131_p3 = scmp.ne.s32.totalorder %s4936_s16, %s4932_s15 }
   0xa   : > { %s5670_s23 = smov (%p35_p0, %s33_s23), 0  ;;  %p132_p5 = scmp.eq.s32.totalorder %s3450_s22, 1 }
   0xb   : > { %p5022_p4 = por %p126_p2, %p125_p1  ;;  %s112_s26 = ssub.s32 %s4948_s19, %s5670_s23 }
   0xc   : > { %p3453_p6 = scmp.ge.s32.totalorder %s4952_s20, 1  ;;  %p113_p7 = scmp.eq.s32.totalorder %s112_s26, 0 }
   0xd   : > { %p5029_p8 = por %p132_p5, %p131_p3  ;;  %p187_p9 = scmp.lt.s32.totalorder %s4952_s20, 3 }
   0xe   : > { %s5035_s28 = scalar_select %p113_p7, %s4940_s17, %s115_s24  }
   0xf   : > { %p188_p10 = pnand %p3453_p6, %p187_p9 }
  0x10   : > { %v4702_v0 = vld [vmem:[%s5658_s1 + $0x1c] sm:$0xff] (!%p188_p10)   ;;  %v5043_v1 = vld [vmem:[%s5658_s1 + $0x54] sm:$0xff] (!%p188_p10)   ;;  %p226_p11 = scmp.lt.s32.totalorder (!%p188_p10), %s4944_s18, 1  ;;  %v4704_v2 = vld [vmem:[%s5658_s1 + $0x24] sm:$0xff] (!%p188_p10)   ;;  %vm433_vm0 = vcmask (!%p188_p10), 457728   ;;  %vm482_vm1 = vcmask (!%p188_p10), 1043456  }
  0x11   : > { %191 = sbr.rel (%p188_p10) target bundleno = 525 (0x20d), region = 28  ;;  %4152 = vmatprep.subr.bf16.mxu1 (!%p188_p10), %v4702_v0  ;;  %4272 = vmatprep.subr.bf16.mxu0 (!%p188_p10), %v5043_v1  ;;  %v5053_v3 = vld [vmem:[%s5658_s1 + $0x5c] sm:$0xff] (!%p188_p10)   ;;  %v4706_v4 = vld [vmem:[%s5658_s1 + $0x2c] sm:$0xff] (!%p188_p10)   ;;  %v5066_v5 = vld [vmem:[%s5658_s1 + $0x64] sm:$0xff] (!%p188_p10)   ;;  %s5398_s5 = sand.u32 (!%p188_p10), 1, %s4936_s16   ;;  %vm3248_vm2 = vcmask (!%p188_p10), 57344  }
  0x12   : > { %4153 = vmatpush3.bf16.msra.mxu1 (!%p188_p10), %v4702_v0  ;;  %4273 = vmatpush3.bf16.msra.mxu0 (!%p188_p10), %v5043_v1  ;;  %v4708_v6 = vld [vmem:[%s5658_s1 + $0x34] ss:$0 sps:$4 sm:$0xff] (!%p188_p10)   ;;  %v5075_v7 = vld [vmem:[%s5658_s1 + $0x6c] ss:$0 sps:$4 sm:$0xff] (!%p188_p10)   ;;  %v4713_v11 = vld [vmem:[%s5658_s1] sm:$0xff] (!%p188_p10)   ;;  %s5401_s6 = scalar_lea.vmem (!%p188_p10), [#allocation2], %s5398_s5 }
  0x13   : > { %4154 = vmatprep.subr.bf16.mxu1 (!%p188_p10), %v4704_v2  ;;  %4274 = vmatprep.subr.bf16.mxu0 (!%p188_p10), %v5053_v3  ;;  %v484_v10 = vsel (!%p188_p10), %vm482_vm1, %v4708_v6, 0  ;;  %v5098_v12 = vsel (!%p188_p10), %vm482_vm1, %v5075_v7, 0  ;;  %v4715_v13 = vld [vmem:[%s5658_s1 + $0x70] sm:$0xff] (!%p188_p10)   ;;  %v4720_v18 = vld [vmem:[%s5658_s1 + $0x78] sm:$0xff] (!%p188_p10)   ;;  %v4724_v22 = vld [vmem:[%s5658_s1 + $0x8] sm:$0xff] (!%p188_p10)   ;;  %s5406_s8 = scalar_lea.vmem (!%p188_p10), [#allocation4], %s5398_s5 }
  0x14   : > { %v4726_v24 = vld [vmem:[%s5658_s1 + $0x80] sm:$0xff] (!%p188_p10)   ;;  %v4731_v26 = vld [vmem:[%s5658_s1 + $0x88] ss:$0 sps:$4 sm:$0xff] (!%p188_p10)   ;;  %v4735_v31 = vld [vmem:[%s5658_s1 + $0x10] sm:$0xff] (!%p188_p10)   ;;  %vm3211_vm3 = vcmask (!%p188_p10), 60416   ;;  %vm2910_vm4 = vcmask (!%p188_p10), 64512  }
  0x15   : > { %v1935_v29 = vsel (!%p188_p10), %vm482_vm1, %v4731_v26, 0  ;;  %v4737_v32 = vld [vmem:[%s5658_s1 + $0x8c] sm:$0xff] (!%p188_p10)   ;;  %v4745_v37 = vld [vmem:[%s5658_s1 + $0x18] ss:$0 sps:$4 sm:$0xff] (!%p188_p10)   ;;  %v4757_v47 = vld [vmem:[%s5658_s1 + $0x9c] sm:$0xff] (!%p188_p10)   ;;  %s3289_s13 = sshll.u32 (!%p188_p10), %s5401_s6, 4  ;;  %s5578_s13 = int_to_ptr.vmem [resolvable:$true] %s3289_s13 }
  0x16   : > { %4155 = vmatpush3.bf16.msra.mxu1 (!%p188_p10), %v4704_v2  ;;  %4275 = vmatpush3.bf16.msra.mxu0 (!%p188_p10), %v5053_v3  ;;  %v797_v38 = vsel (!%p188_p10), %vm482_vm1, %v4745_v37, 0  ;;  %v4747_v43 = vld [vmem:[%s5658_s1 + $0x94] sm:$0xff] (!%p188_p10)   ;;  %v4767_v54 = vld [vmem:[%s5658_s1 + $0xa4] ss:$0 sps:$4 sm:$0xff] (!%p188_p10)   ;;  %v4777_v60 = vld [vmem:[%s5658_s1 + $0xa8] sm:$0xff] (!%p188_p10)   ;;  %s3302_s14 = sshll.u32 (!%p188_p10), %s5406_s8, 4  ;;  %s5587_s14 = int_to_ptr.vmem [resolvable:$true] %s3302_s14 }
  0x17   : > { %4156 = vmatprep.subr.bf16.mxu1 (!%p188_p10), %v4706_v4  ;;  %4276 = vmatprep.subr.bf16.mxu0 (!%p188_p10), %v5066_v5  ;;  %v4755_v45 = vld [vmem:[%s5658_s1 + $0x38] sm:$0xff] (!%p188_p10)   ;;  %v2325_v55 = vsel (!%p188_p10), %vm482_vm1, %v4767_v54, 0  ;;  %v4765_v2 = vld [vmem:[%s5658_s1 + $0x40] sm:$0xff] (!%p188_p10)   ;;  %s3269_s30 = scalar_lea.sflag (!%p188_p10), [#allocation3], %s5398_s5  ;;  %s4955_s9 = smov (!%p188_p10), [#allocation2]  }
  0x18   : > { %s5056_s11 = scalar_select %p226_p11, %s4944_s18, 1 }
  0x19   : > { %s4846_s10 = sshll.u32 %s4955_s9, 4  ;;  %s4847_s10 = int_to_ptr.vmem [resolvable:$false] %s4846_s10 }
  0x1a   : > { %s4640_s22 = smul.u32 176, %s5056_s11  ;;  %4157 = vmatpush3.bf16.msra.mxu1 %v4706_v4  ;;  %4277 = vmatpush3.bf16.msra.mxu0 %v5066_v5  ;;  %v4775_v4 = vld [vmem:[%s5658_s1 + $0x48] sm:$0xff]   ;;  %p4849_p1 = scmp.lt.s32.totalorder %s5578_s13, %s4847_s10 }
  0x1b   : > { %4632 = vmatprep.subr.msk.bf16.mxu1 %vm482_vm1, %v4708_v6  ;;  %4635 = vmatprep.subr.msk.bf16.mxu0 %vm482_vm1, %v5075_v7 }
  0x1c   : > { %s5080_s7 = scalar_lea.vmem %s5657_s0, %s4640_s22 }
  0x1d   : > { %v4710_v8 = vld [vmem:[%s5080_s7 + $0x8] sm:$0xff]   ;;  %v4711_v9 = vld [vmem:[%s5080_s7 + $0x18] sm:$0xff]   ;;  %v4712_v14 = vld [vmem:[%s5080_s7 + $0x10] sm:$0xff]  }
  0x1e   : > { %4160 = vmatprep.mubr.msk.bf16.mxu1 %vm433_vm0, %v4710_v8  ;;  %4280 = vmatprep.mubr.msk.bf16.mxu0 %vm433_vm0, %v4711_v9  ;;  %v4714_v15 = vld [vmem:[%s5080_s7 + $0x20] sm:$0xff]   ;;  %v4716_v16 = vld [vmem:[%s5080_s7 + $0x18] sm:$0xff]   ;;  %v4717_v17 = vld [vmem:[%s5080_s7 + $0x28] sm:$0xff]  }
  0x1f   : > { %4159 = vmatpush3.bf16.msra.mxu1 %v484_v10  ;;  %4279 = vmatpush3.bf16.msra.mxu0 %v5098_v12  ;;  %v4718_v19 = vld [vmem:[%s5080_s7 + $0x20] sm:$0xff]   ;;  %v4719_v20 = vld [vmem:[%s5080_s7 + $0x30] sm:$0xff]   ;;  %v4721_v21 = vld [vmem:[%s5080_s7 + $0x28] sm:$0xff]  }
  0x20   : > { %4192 = vmatprep.subr.bf16.mxu1 %v4713_v11  ;;  %4312 = vmatprep.subr.bf16.mxu0 %v4715_v13  ;;  %v4722_v23 = vld [vmem:[%s5080_s7 + $0x38] sm:$0xff]   ;;  %v4723_v25 = vld [vmem:[%s5080_s7 + $0x30] sm:$0xff]   ;;  %v4725_v27 = vld [vmem:[%s5080_s7 + $0x40] sm:$0xff]  }
  0x21   : > { %v4727_v28 = vld [vmem:[%s5080_s7 + $0x38] sm:$0xff]   ;;  %v4728_v30 = vld [vmem:[%s5080_s7 + $0x48] sm:$0xff]   ;;  %v4729_v33 = vld [vmem:[%s5080_s7 + $0x40] sm:$0xff]  }
  0x22   : > { %4161 = vmatmul.mubr.msk.bf16.vlgmr.msra.gmra.mrb[0].mxu1 %vm433_vm0, %v4712_v14  ;;  %4281 = vmatmul.mubr.msk.bf16.vlgmr.msra.gmra.mrb[0].mxu0 %vm433_vm0, %v4714_v15  ;;  %v4730_v34 = vld [vmem:[%s5080_s7 + $0x50] sm:$0xff]   ;;  %v4732_v35 = vld [vmem:[%s5080_s7 + $0x48] sm:$0xff]   ;;  %v4733_v36 = vld [vmem:[%s5080_s7 + $0x20] sm:$0xff]  }
  0x23   : > { %4193 = vmatpush3.bf16.msra.mxu1 %v4713_v11  ;;  %4313 = vmatpush3.bf16.msra.mxu0 %v4715_v13  ;;  %v4734_v39 = vld [vmem:[%s5080_s7 + $0x50] sm:$0xff]   ;;  %v4736_v40 = vld [vmem:[%s5080_s7 + $0x28] sm:$0xff]   ;;  %v4738_v41 = vld [vmem:[%s5080_s7 + $0x58] sm:$0xff]  }
  0x24   : > { %4164 = vmatprep.mubr.msk.bf16.mxu1 %vm433_vm0, %v4716_v16  ;;  %4284 = vmatprep.mubr.msk.bf16.mxu0 %vm433_vm0, %v4717_v17  ;;  %v4739_v42 = vld [vmem:[%s5080_s7 + $0x30] sm:$0xff]   ;;  %v4740_v44 = vld [vmem:[%s5080_s7 + $0x60] sm:$0xff]   ;;  %v4741_v46 = vld [vmem:[%s5080_s7 + $0x38] sm:$0xff]  }
  0x25   : > { %4314 = vmatprep.subr.bf16.mxu0 %v4720_v18  ;;  %4194 = vmatprep.subr.bf16.mxu1 %v4724_v22  ;;  %v4742_v48 = vld [vmem:[%s5080_s7 + $0x68] sm:$0xff]   ;;  %v4743_v49 = vld [vmem:[%s5080_s7 + $0x40] sm:$0xff]   ;;  %v4744_v50 = vld [vmem:[%s5080_s7 + $0x70] sm:$0xff]  }
  0x26   : > { %v4746_v51 = vld [vmem:[%s5080_s7 + $0x48] sm:$0xff]   ;;  %v4748_v52 = vld [vmem:[%s5080_s7 + $0x78] sm:$0xff]   ;;  %v4749_v53 = vld [vmem:[%s5080_s7 + $0x50] sm:$0xff]  }
  0x27   : > { %4315 = vmatpush3.bf16.msra.mxu0 %v4720_v18  ;;  %4195 = vmatpush3.bf16.msra.mxu1 %v4724_v22  ;;  %v4750_v56 = vld [vmem:[%s5080_s7 + $0x80] sm:$0xff]   ;;  %v4751_v57 = vld [vmem:[%s5080_s7 + $0x58] sm:$0xff]   ;;  %v4754_v61 = vld [vmem:[%s5080_s7 + $0x8] sm:$0xff]  }
  0x28   : > { %4316 = vmatprep.subr.bf16.mxu0 %v4726_v24  ;;  %4196 = vmatprep.subr.bf16.mxu1 %v4735_v31  ;;  %v4752_v58 = vld [vmem:[%s5080_s7] sm:$0xff]   ;;  %v4756_v62 = vld [vmem:[%s5080_s7 + $0x68] sm:$0xff]   ;;  %v4758_v63 = vld [vmem:[%s5080_s7 + $0x10] sm:$0xff]  }
  0x29   : > { %v4753_v59 = vld [vmem:[%s5080_s7 + $0x60] sm:$0xff]   ;;  %v4759_v0 = vld [vmem:[%s5080_s7 + $0x70] sm:$0xff]   ;;  %v4760_v6 = vld [vmem:[%s5080_s7 + $0x18] sm:$0xff]  }
  0x2a   : > { %4165 = vmatmul.mubr.msk.bf16.gmra.mrb[4].mxu1 %vm433_vm0, %v4718_v19  ;;  %4285 = vmatmul.mubr.msk.bf16.gmra.mrb[4].mxu0 %vm433_vm0, %v4719_v20  ;;  %v4761_v8 = vld [vmem:[%s5080_s7 + $0x78] sm:$0xff]   ;;  %v4762_v9 = vld [vmem:[%s5080_s7 + $0x20] sm:$0xff]   ;;  %v4785_v11 = vld [vmem:[%s5658_s1 + $0x50] ss:$0 sps:$4 sm:$0xff]  }
  0x2b   : > { %4168 = vmatprep.mubr.msk.bf16.mxu1 %vm433_vm0, %v4721_v21  ;;  %4288 = vmatprep.mubr.msk.bf16.mxu0 %vm433_vm0, %v4722_v23  ;;  %v4763_v10 = vld [vmem:[%s5080_s7 + $0x80] sm:$0xff]   ;;  %v4764_v13 = vld [vmem:[%s5080_s7 + $0x28] sm:$0xff]   ;;  %v1155_v14 = vsel %vm482_vm1, %v4785_v11, 0  ;;  %v4768_v16 = vld [vmem:[%s5080_s7 + $0x30] sm:$0xff]  }
  0x2c   : > { %4317 = vmatpush3.bf16.msra.mxu0 %v4726_v24  ;;  %4197 = vmatpush3.bf16.msra.mxu1 %v4735_v31  ;;  %v4766_v15 = vld [vmem:[%s5080_s7 + $0x88] sm:$0xff]   ;;  %v4769_v17 = vld [vmem:[%s5080_s7 + $0x90] sm:$0xff]   ;;  %v4770_v18 = vld [vmem:[%s5080_s7 + $0x38] sm:$0xff]  }
  0x2d   : > { %4637 = vmatprep.subr.msk.bf16.mxu0 %vm482_vm1, %v4731_v26  ;;  %4633 = vmatprep.subr.msk.bf16.mxu1 %vm482_vm1, %v4745_v37  ;;  %v4771_v19 = vld [vmem:[%s5080_s7 + $0x98] sm:$0xff]   ;;  %v4772_v20 = vld [vmem:[%s5080_s7 + $0x40] sm:$0xff]   ;;  %v4773_v21 = vld [vmem:[%s5080_s7 + $0x28] sm:$0xff]  }
  0x2e   : > { %v4774_v22 = vld [vmem:[%s5080_s7 + $0x48] sm:$0xff]   ;;  %v4776_v23 = vld [vmem:[%s5080_s7 + $0x30] sm:$0xff]   ;;  %v4789_v37 = vld [vmem:[%s5080_s7 + $0x58] sm:$0xff]  }
  0x2f   : > { %v4778_v24 = vld [vmem:[%s5080_s7 + $0x50] sm:$0xff]   ;;  %v4783_v31 = vld [vmem:[%s5080_s7 + $0x48] sm:$0xff]  }
  0x30   : > { %4319 = vmatpush3.bf16.msra.mxu0 %v1935_v29  ;;  %4199 = vmatpush3.bf16.msra.mxu1 %v797_v38  ;;  %v4787_v26 = vld [vmem:[%s5658_s1 + $0xb0] sm:$0xff]   ;;  %v4781_v29 = vld [vmem:[%s5080_s7 + $0x40] sm:$0xff]   ;;  %v4790_v38 = vld [vmem:[%s5080_s7 + $0x78] sm:$0xff]  }
  0x31   : > { %4352 = vmatprep.subr.bf16.mxu0 %v4737_v32  ;;  %4232 = vmatprep.subr.bf16.mxu1 %v4755_v45 }
  0x32   : > { %4169 = vmatmul.mubr.msk.bf16.gmra.mrb[8].mxu1 %vm433_vm0, %v4723_v25  ;;  %4289 = vmatmul.mubr.msk.bf16.gmra.mrb[8].mxu0 %vm433_vm0, %v4725_v27  ;;  %v4779_v25 = vld [vmem:[%s5080_s7 + $0x38] sm:$0xff]  }
  0x33   : > { %4172 = vmatprep.mubr.msk.bf16.mxu1 %vm433_vm0, %v4727_v28  ;;  %4292 = vmatprep.mubr.msk.bf16.mxu0 %vm433_vm0, %v4728_v30  ;;  %v4780_v27 = vld [vmem:[%s5080_s7 + $0x58] sm:$0xff]   ;;  %v4782_v30 = vld [vmem:[%s5080_s7 + $0x60] sm:$0xff]  }
  0x34   : > { %v4796_v28 = vld [vmem:[%s5658_s1 + $0xb8] sm:$0xff]  }
  0x3a   : > { %4173 = vmatmul.mubr.msk.bf16.gmra.mrb[12].mxu1 %vm433_vm0, %v4729_v33  ;;  %4293 = vmatmul.mubr.msk.bf16.gmra.mrb[12].mxu0 %vm433_vm0, %v4730_v34  ;;  %v4784_v33 = vld [vmem:[%s5080_s7 + $0x68] sm:$0xff]  }
  0x3b   : > { %4176 = vmatprep.mubr.msk.bf16.mxu1 %vm433_vm0, %v4732_v35  ;;  %4320 = vmatprep.mubr.msk.bf16.mxu0 %vm433_vm0, %v4733_v36  ;;  %v4786_v35 = vld [vmem:[%s5080_s7 + $0x50] sm:$0xff]  }
  0x3c   : > { %v4788_v36 = vld [vmem:[%s5080_s7 + $0x70] sm:$0xff]  }
  0x42   : > { %4177 = vmatmul.mubr.msk.bf16.gmra.mrb[16].mxu1 %vm433_vm0, %v4734_v39  ;;  %4321 = vmatmul.mubr.msk.bf16.vlgmr.msra.gmra.mrb[0].mxu0 %vm433_vm0, %v4736_v40  ;;  %v4791_v39 = vld [vmem:[%s5080_s7 + $0x60] sm:$0xff]   ;;  %v4792_v40 = vld [vmem:[%s5080_s7 + $0x10] sm:$0xff]  }
  0x43   : > { %4180 = vmatprep.mubr.msk.bf16.mxu1 %vm433_vm0, %v4738_v41  ;;  %4353 = vmatpush3.bf16.msra.mxu0 %v4737_v32  ;;  %v4805_v32 = vld [vmem:[%s5658_s1 + $0xc0] ss:$0 sps:$4 sm:$0xff]   ;;  %v4793_v41 = vld [vmem:[%s5080_s7 + $0x68] sm:$0xff]  }
  0x44   : > { %4324 = vmatprep.mubr.msk.bf16.mxu0 %vm433_vm0, %v4739_v42  ;;  %4354 = vmatprep.subr.bf16.mxu0 %v4747_v43  ;;  %v2715_v34 = vsel %vm482_vm1, %v4805_v32, 0  ;;  %v4794_v42 = vld [vmem:[%s5080_s7 + $0x18] sm:$0xff]  }
  0x47   : > { %4355 = vmatpush3.bf16.msra.mxu0 %v4747_v43  ;;  %v4795_v43 = vld [vmem:[%s5080_s7 + $0x70] sm:$0xff]  }
  0x48   : > { %4356 = vmatprep.subr.bf16.mxu0 %v4757_v47 }
  0x4a   : > { %4181 = vmatmul.mubr.msk.bf16.gmra.mrb[20].mxu1 %vm433_vm0, %v4740_v44  ;;  %4325 = vmatmul.mubr.msk.bf16.gmra.mrb[4].mxu0 %vm433_vm0, %v4741_v46  ;;  %v4797_v44 = vld [vmem:[%s5080_s7 + $0x20] sm:$0xff]   ;;  %v4799_v46 = vld [vmem:[%s5080_s7 + $0x28] sm:$0xff]  }
  0x4b   : > { %4184 = vmatprep.mubr.msk.bf16.mxu1 %vm433_vm0, %v4742_v48  ;;  %4328 = vmatprep.mubr.msk.bf16.mxu0 %vm433_vm0, %v4743_v49  ;;  %v4801_v48 = vld [vmem:[%s5080_s7 + $0x30] sm:$0xff]   ;;  %v4802_v49 = vld [vmem:[%s5080_s7 + $0x88] sm:$0xff]  }
  0x4c   : > { %4357 = vmatpush3.bf16.msra.mxu0 %v4757_v47  ;;  %v4800_v47 = vld [vmem:[%s5080_s7 + $0x80] sm:$0xff]  }
  0x4d   : > { %4638 = vmatprep.subr.msk.bf16.mxu0 %vm482_vm1, %v4767_v54  ;;  %v4813_v54 = vld [vmem:[%s5080_s7 + $0x38] sm:$0xff]  }
  0x50   : > { %4359 = vmatpush3.bf16.msra.mxu0 %v2325_v55  ;;  %v4814_v55 = vld [vmem:[%s5080_s7 + $0x60] sm:$0xff]  }
  0x51   : > { %4392 = vmatprep.subr.bf16.mxu0 %v4777_v60 }
  0x52   : > { %4185 = vmatmul.mubr.msk.bf16.gmra.mrb[24].mxu1 %vm433_vm0, %v4744_v50  ;;  %4329 = vmatmul.mubr.msk.bf16.gmra.mrb[8].mxu0 %vm433_vm0, %v4746_v51  ;;  %v4806_v50 = vld [vmem:[%s5080_s7 + $0x40] sm:$0xff]   ;;  %v4807_v51 = vld [vmem:[%s5080_s7 + $0x98] sm:$0xff]  }
  0x53   : > { %4188 = vmatprep.mubr.msk.bf16.mxu1 %vm433_vm0, %v4748_v52  ;;  %4332 = vmatprep.mubr.msk.bf16.mxu0 %vm433_vm0, %v4749_v53  ;;  %v4810_v52 = vld [vmem:[%s5080_s7 + $0x50] sm:$0xff]  }
  0x54   : > { %v4811_v53 = vld [vmem:[%s5080_s7 + $0x30] sm:$0xff]  }
  0x5a   : > { %4189 = vmatmul.mubr.msk.bf16.gmra.mrb[28].mxu1 %vm433_vm0, %v4750_v56  ;;  %4333 = vmatmul.mubr.msk.bf16.gmra.mrb[12].mxu0 %vm433_vm0, %v4751_v57  ;;  %v4815_v56 = vld [vmem:[%s5080_s7 + $0x40] sm:$0xff]   ;;  %v4816_v57 = vld [vmem:[%s5080_s7 + $0x68] sm:$0xff]  }
  0x5b   : > { %4200 = vmatprep.mubr.msk.bf16.mxu1 %vm433_vm0, %v4752_v58  ;;  %4336 = vmatprep.mubr.msk.bf16.mxu0 %vm433_vm0, %v4753_v59  ;;  %v4817_v58 = vld [vmem:[%s5080_s7 + $0x48] sm:$0xff]   ;;  %v4818_v59 = vld [vmem:[%s5080_s7 + $0x70] sm:$0xff]  }
  0x62   : > { %4201 = vmatmul.mubr.msk.bf16.vlgmr.msra.gmra.mrb[0].mxu1 %vm433_vm0, %v4754_v61  ;;  %4337 = vmatmul.mubr.msk.bf16.gmra.mrb[16].mxu0 %vm433_vm0, %v4756_v62  ;;  %v4820_v61 = vld [vmem:[%s5080_s7 + $0x78] sm:$0xff]  }
  0x63   : > { %4233 = vmatpush3.bf16.msra.mxu1 %v4755_v45  ;;  %4204 = vmatprep.mubr.msk.bf16.mxu1 %vm433_vm0, %v4758_v63  ;;  %v4798_v45 = vld [vmem:[%s5080_s7 + $0x78] sm:$0xff]   ;;  %v4822_v63 = vld [vmem:[%s5080_s7 + $0x80] sm:$0xff]  }
  0x64   : > { %4340 = vmatprep.mubr.msk.bf16.mxu0 %vm433_vm0, %v4759_v0  ;;  %4234 = vmatprep.subr.bf16.mxu1 %v4765_v2  ;;  %v4821_v62 = vld [vmem:[%s5080_s7 + $0x58] sm:$0xff]   ;;  %v4823_v0 = vld [vmem:[%s5080_s7 + $0x60] sm:$0xff]  }
  0x67   : > { %4235 = vmatpush3.bf16.msra.mxu1 %v4765_v2  ;;  %v4824_v2 = vld [vmem:[%s5080_s7 + $0x88] sm:$0xff]  }
  0x68   : > { %4236 = vmatprep.subr.bf16.mxu1 %v4775_v4 }
  0x6a   : > { %4205 = vmatmul.mubr.msk.bf16.gmra.mrb[4].mxu1 %vm433_vm0, %v4760_v6  ;;  %4341 = vmatmul.mubr.msk.bf16.gmra.mrb[20].mxu0 %vm433_vm0, %v4761_v8  ;;  %v4826_v6 = vld [vmem:[%s5080_s7 + $0x58] sm:$0xff]   ;;  %v4827_v8 = vld [vmem:[%s5080_s7 + $0x70] sm:$0xff]  }
  0x6b   : > { %4208 = vmatprep.mubr.msk.bf16.mxu1 %vm433_vm0, %v4762_v9  ;;  %4344 = vmatprep.mubr.msk.bf16.mxu0 %vm433_vm0, %v4763_v10  ;;  %v4828_v9 = vld [vmem:[%s5080_s7 + $0x60] sm:$0xff]   ;;  %v4829_v10 = vld [vmem:[%s5080_s7 + $0x78] sm:$0xff]  }
  0x6c   : > { %4237 = vmatpush3.bf16.msra.mxu1 %v4775_v4  ;;  %v4825_v4 = vld [vmem:[%s5080_s7 + $0x68] sm:$0xff]  }
  0x6d   : > { %4634 = vmatprep.subr.msk.bf16.mxu1 %vm482_vm1, %v4785_v11  ;;  %v4830_v11 = vld [vmem:[%s5080_s7 + $0x68] sm:$0xff]  }
  0x70   : > { %4239 = vmatpush3.bf16.msra.mxu1 %v1155_v14  ;;  %v4832_v14 = vld [vmem:[%s5080_s7 + $0x70] sm:$0xff]  }
  0x71   : > { %4432 = vmatprep.subr.bf16.mxu1 %v5043_v1 }
  0x72   : > { %4209 = vmatmul.mubr.msk.bf16.gmra.mrb[8].mxu1 %vm433_vm0, %v4764_v13  ;;  %4345 = vmatmul.mubr.msk.bf16.gmra.mrb[24].mxu0 %vm433_vm0, %v4766_v15  ;;  %v4831_v13 = vld [vmem:[%s5080_s7 + $0x80] sm:$0xff]   ;;  %v4833_v15 = vld [vmem:[%s5080_s7 + $0x88] sm:$0xff]  }
  0x73   : > { %4212 = vmatprep.mubr.msk.bf16.mxu1 %vm433_vm0, %v4768_v16  ;;  %4348 = vmatprep.mubr.msk.bf16.mxu0 %vm433_vm0, %v4769_v17  ;;  %v4834_v16 = vld [vmem:[%s5080_s7 + $0x78] sm:$0xff]   ;;  %v4835_v17 = vld [vmem:[%s5080_s7 + $0x90] sm:$0xff]  }
  0x7a   : > { %4213 = vmatmul.mubr.msk.bf16.gmra.mrb[12].mxu1 %vm433_vm0, %v4770_v18  ;;  %4349 = vmatmul.mubr.msk.bf16.gmra.mrb[28].mxu0 %vm433_vm0, %v4771_v19  ;;  %v4836_v18 = vld [vmem:[%s5080_s7 + $0x80] sm:$0xff]   ;;  %v4837_v19 = vld [vmem:[%s5080_s7 + $0x98] sm:$0xff]  }
  0x7b   : > { %4216 = vmatprep.mubr.msk.bf16.mxu1 %vm433_vm0, %v4772_v20  ;;  %4360 = vmatprep.mubr.msk.bf16.mxu0 %vm433_vm0, %v4773_v21  ;;  %v4838_v20 = vld [vmem:[%s5080_s7 + $0x88] sm:$0xff]   ;;  %v4839_v21 = vld [vmem:[%s5080_s7 + $0xa0] sm:$0xff]  }
  0x82   : > { %4217 = vmatmul.mubr.msk.bf16.gmra.mrb[16].mxu1 %vm433_vm0, %v4774_v22  ;;  %4361 = vmatmul.mubr.msk.bf16.vlgmr.msra.gmra.mrb[0].mxu0 %vm433_vm0, %v4776_v23  ;;  %v4840_v22 = vld [vmem:[%s5080_s7 + $0x90] sm:$0xff]   ;;  %v4841_v23 = vld [vmem:[%s5080_s7 + $0xa8] sm:$0xff]  }
  0x83   : > { %4220 = vmatprep.mubr.msk.bf16.mxu1 %vm433_vm0, %v4778_v24  ;;  %4393 = vmatpush3.bf16.msra.mxu0 %v4777_v60  ;;  %v4819_v60 = vld [vmem:[%s5080_s7 + $0x50] sm:$0xff]   ;;  %v4954_v24 = vmov 0.0  }
  0x84   : > { %4364 = vmatprep.mubr.msk.bf16.mxu0 %vm433_vm0, %v4779_v25  ;;  %4394 = vmatprep.subr.bf16.mxu0 %v4787_v26  ;;  %3249 = vst.msk [vmem:[%s5401_s6] sm:$0x1] %vm3248_vm2, %v4954_v24  ;;  %3250 = vst.msk [vmem:[%s5406_s8] sm:$0x1] %vm3248_vm2, %v4954_v24 }
  0x87   : > { %4395 = vmatpush3.bf16.msra.mxu0 %v4787_v26 }
  0x88   : > { %4396 = vmatprep.subr.bf16.mxu0 %v4796_v28 }
  0x8a   : > { %4221 = vmatmul.mubr.msk.bf16.gmra.mrb[20].mxu1 %vm433_vm0, %v4780_v27  ;;  %4365 = vmatmul.mubr.msk.bf16.gmra.mrb[4].mxu0 %vm433_vm0, %v4781_v29 }
  0x8b   : > { %4224 = vmatprep.mubr.msk.bf16.mxu1 %vm433_vm0, %v4782_v30  ;;  %4368 = vmatprep.mubr.msk.bf16.mxu0 %vm433_vm0, %v4783_v31 }
  0x8c   : > { %4397 = vmatpush3.bf16.msra.mxu0 %v4796_v28 }
  0x8d   : > { %4639 = vmatprep.subr.msk.bf16.mxu0 %vm482_vm1, %v4805_v32 }
  0x90   : > { %4399 = vmatpush3.bf16.msra.mxu0 %v2715_v34 }
  0x92   : > { %4225 = vmatmul.mubr.msk.bf16.gmra.mrb[24].mxu1 %vm433_vm0, %v4784_v33  ;;  %4369 = vmatmul.mubr.msk.bf16.gmra.mrb[8].mxu0 %vm433_vm0, %v4786_v35 }
  0x93   : > { %4228 = vmatprep.mubr.msk.bf16.mxu1 %vm433_vm0, %v4788_v36  ;;  %4372 = vmatprep.mubr.msk.bf16.mxu0 %vm433_vm0, %v4789_v37 }
  0x9a   : > { %4229 = vmatmul.mubr.msk.bf16.gmra.mrb[28].mxu1 %vm433_vm0, %v4790_v38  ;;  %4373 = vmatmul.mubr.msk.bf16.gmra.mrb[12].mxu0 %vm433_vm0, %v4791_v39 }
  0x9b   : > { %4240 = vmatprep.mubr.msk.bf16.mxu1 %vm433_vm0, %v4792_v40  ;;  %4376 = vmatprep.mubr.msk.bf16.mxu0 %vm433_vm0, %v4793_v41 }
  0xa2   : > { %4241 = vmatmul.mubr.msk.bf16.vlgmr.msra.gmra.mrb[0].mxu1 %vm433_vm0, %v4794_v42  ;;  %4377 = vmatmul.mubr.msk.bf16.gmra.mrb[16].mxu0 %vm433_vm0, %v4795_v43 }
  0xa3   : > { %4436 = vmatpush3.bf16.msra.mxu1 %v5043_v1  ;;  %4244 = vmatprep.mubr.msk.bf16.mxu1 %vm433_vm0, %v4797_v44  ;;  %v4803_v1 = vld [vmem:[%s5080_s7 + $0x38] sm:$0xff]  }
  0xa4   : > { %4380 = vmatprep.mubr.msk.bf16.mxu0 %vm433_vm0, %v4798_v45  ;;  %4433 = vmatprep.subr.bf16.mxu1 %v5053_v3 }
  0xa7   : > { %4437 = vmatpush3.bf16.msra.mxu1 %v5053_v3  ;;  %v4804_v3 = vld [vmem:[%s5080_s7 + $0x90] sm:$0xff]  }
  0xa8   : > { %4434 = vmatprep.subr.bf16.mxu1 %v5066_v5 }
  0xaa   : > { %4245 = vmatmul.mubr.msk.bf16.gmra.mrb[4].mxu1 %vm433_vm0, %v4799_v46  ;;  %4381 = vmatmul.mubr.msk.bf16.gmra.mrb[20].mxu0 %vm433_vm0, %v4800_v47 }
  0xab   : > { %4248 = vmatprep.mubr.msk.bf16.mxu1 %vm433_vm0, %v4801_v48  ;;  %4384 = vmatprep.mubr.msk.bf16.mxu0 %vm433_vm0, %v4802_v49 }
  0xac   : > { %4438 = vmatpush3.bf16.msra.mxu1 %v5066_v5  ;;  %v4808_v5 = vld [vmem:[%s5080_s7 + $0x48] sm:$0xff]  }
  0xad   : > { %4636 = vmatprep.subr.msk.bf16.mxu1 %vm482_vm1, %v5075_v7  ;;  %v4809_v7 = vld [vmem:[%s5080_s7 + $0xa0] sm:$0xff]  }
  0xb0   : > { %4439 = vmatpush3.bf16.msra.mxu1 %v5098_v12  ;;  %v4812_v12 = vld [vmem:[%s5080_s7 + $0x58] sm:$0xff]   ;;  %s3979_s7 = sshll.u32 %s5056_s11, 7  ;;  %s3975_s11 = sshll.u32 %s4944_s18, 4 }
  0xb1   : > { %s5430_s12 = scalar_lea.vmem %s5659_s2, %s3979_s7  ;;  %s5576_s24 = scalar_lea.hbm %s5660_s3, %s3975_s11 }
  0xb2   : > { %4249 = vmatmul.mubr.msk.bf16.gmra.mrb[8].mxu1 %vm433_vm0, %v4803_v1  ;;  %4385 = vmatmul.mubr.msk.bf16.gmra.mrb[24].mxu0 %vm433_vm0, %v4804_v3  ;;  %s5585_s29 = scalar_lea.hbm %s5661_s4, %s3975_s11  ;;  %s4842_s7 = scalar_lea.vmem %s5578_s13, 16 }
  0xb3   : > { %4252 = vmatprep.mubr.msk.bf16.mxu1 %vm433_vm0, %v4806_v50  ;;  %4388 = vmatprep.mubr.msk.bf16.mxu0 %vm433_vm0, %v4807_v51  ;;  %p4843_p12 = scmp.ne.s32.totalorder %s5578_s13, %s4842_s7 }
  0xb5   : > { %p4844_p13 = pnand %p4843_p12, %p5022_p4 }
  0xb7   : > { %p4845_p0 = pneg %p4844_p13 }
  0xba   : > { %4253 = vmatmul.mubr.msk.bf16.gmra.mrb[12].mxu1 %vm433_vm0, %v4808_v5  ;;  %4389 = vmatmul.mubr.msk.bf16.gmra.mrb[28].mxu0 %vm433_vm0, %v4809_v7 }
  0xbb   : > { %4256 = vmatprep.mubr.msk.bf16.mxu1 %vm433_vm0, %v4810_v52  ;;  %4400 = vmatprep.mubr.msk.bf16.mxu0 %vm433_vm0, %v4811_v53 }
  0xc2   : > { %4257 = vmatmul.mubr.msk.bf16.gmra.mrb[16].mxu1 %vm433_vm0, %v4812_v12  ;;  %4401 = vmatmul.mubr.msk.bf16.vlgmr.msra.gmra.mrb[0].mxu0 %vm433_vm0, %v4813_v54 }
  0xc3   : > { %4260 = vmatprep.mubr.msk.bf16.mxu1 %vm433_vm0, %v4814_v55  ;;  %4404 = vmatprep.mubr.msk.bf16.mxu0 %vm433_vm0, %v4815_v56 }
  0xca   : > { %4261 = vmatmul.mubr.msk.bf16.gmra.mrb[20].mxu1 %vm433_vm0, %v4816_v57  ;;  %4405 = vmatmul.mubr.msk.bf16.gmra.mrb[4].mxu0 %vm433_vm0, %v4817_v58 }
  0xcb   : > { %4264 = vmatprep.mubr.msk.bf16.mxu1 %vm433_vm0, %v4818_v59  ;;  %4408 = vmatprep.mubr.msk.bf16.mxu0 %vm433_vm0, %v4819_v60 }
  0xd2   : > { %4265 = vmatmul.mubr.msk.bf16.gmra.mrb[24].mxu1 %vm433_vm0, %v4820_v61  ;;  %4409 = vmatmul.mubr.msk.bf16.gmra.mrb[8].mxu0 %vm433_vm0, %v4821_v62 }
  0xd3   : > { %4268 = vmatprep.mubr.msk.bf16.mxu1 %vm433_vm0, %v4822_v63  ;;  %4412 = vmatprep.mubr.msk.bf16.mxu0 %vm433_vm0, %v4823_v0 }
  0xda   : > { %4269 = vmatmul.mubr.msk.bf16.gmra.mrb[28].mxu1 %vm433_vm0, %v4824_v2  ;;  %4413 = vmatmul.mubr.msk.bf16.gmra.mrb[12].mxu0 %vm433_vm0, %v4825_v4 }
  0xdb   : > { %4296 = vmatprep.mubr.msk.bf16.mxu1 %vm433_vm0, %v4826_v6  ;;  %4416 = vmatprep.mubr.msk.bf16.mxu0 %vm433_vm0, %v4827_v8 }
  0xe2   : > { %4297 = vmatmul.mubr.msk.bf16.vlgmr.msra.gmra.mrb[16].mxu1 %vm433_vm0, %v4828_v9  ;;  %4417 = vmatmul.mubr.msk.bf16.gmra.mrb[16].mxu0 %vm433_vm0, %v4829_v10 }
  0xe3   : > { %4300 = vmatprep.mubr.msk.bf16.mxu1 %vm433_vm0, %v4830_v11  ;;  %4420 = vmatprep.mubr.msk.bf16.mxu0 %vm433_vm0, %v4831_v13 }
  0xea   : > { %4301 = vmatmul.mubr.msk.bf16.gmra.mrb[20].mxu1 %vm433_vm0, %v4832_v14  ;;  %4421 = vmatmul.mubr.msk.bf16.gmra.mrb[20].mxu0 %vm433_vm0, %v4833_v15 }
  0xeb   : > { %4304 = vmatprep.mubr.msk.bf16.mxu1 %vm433_vm0, %v4834_v16  ;;  %4424 = vmatprep.mubr.msk.bf16.mxu0 %vm433_vm0, %v4835_v17 }
  0xf2   : > { %4305 = vmatmul.mubr.msk.bf16.gmra.mrb[24].mxu1 %vm433_vm0, %v4836_v18  ;;  %4425 = vmatmul.mubr.msk.bf16.gmra.mrb[24].mxu0 %vm433_vm0, %v4837_v19 }
  0xf3   : > { %4308 = vmatprep.mubr.msk.bf16.mxu1 %vm433_vm0, %v4838_v20  ;;  %4428 = vmatprep.mubr.msk.bf16.mxu0 %vm433_vm0, %v4839_v21 }
  0xfa   : > { %4309 = vmatmul.mubr.msk.bf16.gmra.mrb[28].mxu1 %vm433_vm0, %v4840_v22  ;;  %4429 = vmatmul.mubr.msk.bf16.gmra.mrb[28].mxu0 %vm433_vm0, %v4841_v23 }
 0x175   : > { %v4242_v25 = vpop.f32.mrb[0].mxu1 }
 0x176   : > { %v1191_v26 = vpop.f32.mrb[1].mxu1 }
 0x177   : > { %v4243_v27 = vpop.f32.mrb[2].mxu1 }
 0x178   : > { %v1194_v28 = vpop.f32.mrb[3].mxu1 }
 0x17d   : > { %v4246_v29 = vpop.f32.mrb[4].mxu1 }
 0x17e   : > { %v1207_v30 = vpop.f32.mrb[5].mxu1 }
 0x17f   : > { %v4247_v31 = vpop.f32.mrb[6].mxu1 }
 0x180   : > { %v1210_v32 = vpop.f32.mrb[7].mxu1 }
 0x185   : > { %v5410_v33 = vpop.f32.mrb[8].mxu1 }
 0x186   : > { %v5412_v34 = vpop.f32.mrb[9].mxu1 }
 0x187   : > { %v5414_v35 = vpop.f32.mrb[10].mxu1 }
 0x188   : > { %v5416_v36 = vpop.f32.mrb[11].mxu1 }
 0x18d   : > { %v5418_v37 = vpop.f32.mrb[12].mxu1 }
 0x18e   : > { %v5420_v38 = vpop.f32.mrb[13].mxu1 }
 0x18f   : > { %v5422_v39 = vpop.f32.mrb[14].mxu1 }
 0x190   : > { %v5424_v40 = vpop.f32.mrb[15].mxu1 }
 0x195   : > { %v4402_v41 = vpop.f32.mrb[0].mxu0 }
 0x196   : > { %v4440_v42 = vadd.f32 %v4402_v41, %v4242_v25  ;;  %v2751_v43 = vpop.f32.mrb[1].mxu0 }
 0x197   : > { %v4441_v44 = vadd.f32 %v2751_v43, %v1191_v26  ;;  %v4403_v45 = vpop.f32.mrb[2].mxu0 }
 0x198   : > { %v3982_v46 = vpack.c.bf16 %v4440_v42, %v4440_v42  ;;  %v4442_v47 = vadd.f32 %v4403_v45, %v4243_v27  ;;  %v2754_v48 = vpop.f32.mrb[3].mxu0  ;;  %v2983_v50 = vmul.f32 %v4440_v42, %v4440_v42  ;;  %v2914_v55 = vsel %vm2910_vm4, %v4440_v42, 0.0 }
 0x199   : > { %v2981_v49 = vmul.f32 %v4441_v44, %v4441_v44  ;;  %v3980_v1 = vpack.c.bf16 %v4441_v44, %v4441_v44  ;;  %v4443_v3 = vadd.f32 %v2754_v48, %v1194_v28  ;;  %v2911_v5 = vsel %vm2910_vm4, %v4441_v44, 0.0 }
 0x19a   : > { %3214 = vst.msk [vmem:[%s5430_s12 + $0x8] sm:$0xf] %vm3211_vm3, %v3982_v46  ;;  %v3983_v51 = vpack.c.bf16 %v4442_v47, %v4442_v47  ;;  %v2984_v12 = vmul.f32 %v4442_v47, %v4442_v47  ;;  %v3016_v63 = vsel %vm2910_vm4, %v2983_v50, 0.0  ;;  %v2916_v4 = vsel %vm2910_vm4, %v4442_v47, 0.0 }
 0x19b   : > { %3212 = vst.msk [vmem:[%s5430_s12] sm:$0xf] %vm3211_vm3, %v3980_v1  ;;  %v2912_v7 = vsel %vm2910_vm4, %v4443_v3, 0.0  ;;  %v2982_v52 = vmul.f32 %v4443_v3, %v4443_v3  ;;  %v3981_v53 = vpack.c.bf16 %v4443_v3, %v4443_v3  ;;  %v3013_v56 = vsel %vm2910_vm4, %v2981_v49, 0.0 }
 0x19c   : > { %3215 = vst.msk [vmem:[%s5430_s12 + $0xc] sm:$0xf] %vm3211_vm3, %v3983_v51  ;;  %v2913_v54 = vadd.f32 %v2912_v7, %v2911_v5  ;;  %v3018_v6 = vsel %vm2910_vm4, %v2984_v12, 0.0 }
 0x19d   : > { %v3014_v57 = vsel %vm2910_vm4, %v2982_v52, 0.0  ;;  %3213 = vst.msk [vmem:[%s5430_s12 + $0x4] sm:$0xf] %vm3211_vm3, %v3981_v53  ;;  %v4406_v58 = vpop.f32.mrb[4].mxu0 }
 0x19e   : > { %v2915_v59 = vadd.f32 %v2914_v55, %v2913_v54  ;;  %v3015_v60 = vadd.f32 %v3014_v57, %v3013_v56  ;;  %v4444_v61 = vadd.f32 %v4406_v58, %v4246_v29  ;;  %v2767_v62 = vpop.f32.mrb[5].mxu0 }
 0x19f   : > { %v4445_v0 = vadd.f32 %v2767_v62, %v1207_v30  ;;  %v4407_v2 = vpop.f32.mrb[6].mxu0 }
 0x1a0   : > { %v3017_v8 = vadd.f32 %v3016_v63, %v3015_v60  ;;  %v3986_v9 = vpack.c.bf16 %v4444_v61, %v4444_v61  ;;  %v2770_v10 = vpop.f32.mrb[7].mxu0  ;;  %v2917_v11 = vadd.f32 %v2916_v4, %v2915_v59  ;;  %v4446_v17 = vadd.f32 %v4407_v2, %v4247_v31 }
 0x1a1   : > { %v2918_v13 = vsel %vm2910_vm4, %v4445_v0, 0.0  ;;  %v2985_v14 = vmul.f32 %v4445_v0, %v4445_v0  ;;  %v3984_v15 = vpack.c.bf16 %v4445_v0, %v4445_v0  ;;  %v4447_v18 = vadd.f32 %v2770_v10, %v1210_v32 }
 0x1a2   : > { %3218 = vst.msk [vmem:[%s5430_s12 + $0x18] sm:$0xf] %vm3211_vm3, %v3986_v9  ;;  %v3019_v16 = vadd.f32 %v3018_v6, %v3017_v8  ;;  %v2919_v19 = vadd.f32 %v2918_v13, %v2917_v11  ;;  %v2987_v21 = vmul.f32 %v4444_v61, %v4444_v61  ;;  %v3987_v23 = vpack.c.bf16 %v4446_v17, %v4446_v17 }
 0x1a3   : > { %v3020_v20 = vsel %vm2910_vm4, %v2985_v14, 0.0  ;;  %3216 = vst.msk [vmem:[%s5430_s12 + $0x10] sm:$0xf] %vm3211_vm3, %v3984_v15  ;;  %v2920_v24 = vsel %vm2910_vm4, %v4447_v18, 0.0  ;;  %v2986_v25 = vmul.f32 %v4447_v18, %v4447_v18  ;;  %v3985_v26 = vpack.c.bf16 %v4447_v18, %v4447_v18 }
 0x1a4   : > { %v3021_v22 = vadd.f32 %v3020_v20, %v3019_v16  ;;  %3219 = vst.msk [vmem:[%s5430_s12 + $0x1c] sm:$0xf] %vm3211_vm3, %v3987_v23  ;;  %v2921_v28 = vadd.f32 %v2920_v24, %v2919_v19  ;;  %v2922_v31 = vsel %vm2910_vm4, %v4444_v61, 0.0  ;;  %v2988_v32 = vmul.f32 %v4446_v17, %v4446_v17 }
 0x1a5   : > { %v4410_v27 = vpop.f32.mrb[8].mxu0  ;;  %v3022_v41 = vsel %vm2910_vm4, %v2986_v25, 0.0  ;;  %3217 = vst.msk [vmem:[%s5430_s12 + $0x14] sm:$0xf] %vm3211_vm3, %v3985_v26  ;;  %v3024_v44 = vsel %vm2910_vm4, %v2987_v21, 0.0  ;;  %v2924_v45 = vsel %vm2910_vm4, %v4446_v17, 0.0 }
 0x1a6   : > { %v4448_v29 = vadd.f32 %v4410_v27, %v5410_v33  ;;  %v2783_v30 = vpop.f32.mrb[9].mxu0  ;;  %v2923_v46 = vadd.f32 %v2922_v31, %v2921_v28  ;;  %v3023_v47 = vadd.f32 %v3022_v41, %v3021_v22 }
 0x1a7   : > { %v4449_v42 = vadd.f32 %v2783_v30, %v5412_v34  ;;  %v4411_v43 = vpop.f32.mrb[10].mxu0  ;;  %v3026_v34 = vsel %vm2910_vm4, %v2988_v32, 0.0 }
 0x1a8   : > { %v2786_v33 = vpop.f32.mrb[11].mxu0  ;;  %v3990_v48 = vpack.c.bf16 %v4448_v29, %v4448_v29  ;;  %v3025_v50 = vadd.f32 %v3024_v44, %v3023_v47  ;;  %v2925_v51 = vadd.f32 %v2924_v45, %v2923_v46  ;;  %v4450_v5 = vadd.f32 %v4411_v43, %v5414_v35 }
 0x1a9   : > { %v2926_v49 = vsel %vm2910_vm4, %v4449_v42, 0.0  ;;  %v2989_v1 = vmul.f32 %v4449_v42, %v4449_v42  ;;  %v3988_v3 = vpack.c.bf16 %v4449_v42, %v4449_v42  ;;  %v4451_v52 = vadd.f32 %v2786_v33, %v5416_v36 }
 0x1aa   : > { %3222 = vst.msk [vmem:[%s5430_s12 + $0x28] sm:$0xf] %vm3211_vm3, %v3990_v48  ;;  %v2991_v53 = vmul.f32 %v4448_v29, %v4448_v29  ;;  %v2927_v12 = vadd.f32 %v2926_v49, %v2925_v51  ;;  %v3027_v54 = vadd.f32 %v3026_v34, %v3025_v50  ;;  %v3991_v55 = vpack.c.bf16 %v4450_v5, %v4450_v5 }
 0x1ab   : > { %v3028_v7 = vsel %vm2910_vm4, %v2989_v1, 0.0  ;;  %3220 = vst.msk [vmem:[%s5430_s12 + $0x20] sm:$0xf] %vm3211_vm3, %v3988_v3  ;;  %v2928_v56 = vsel %vm2910_vm4, %v4451_v52, 0.0  ;;  %v2990_v57 = vmul.f32 %v4451_v52, %v4451_v52  ;;  %v3989_v35 = vpack.c.bf16 %v4451_v52, %v4451_v52 }
 0x1ac   : > { %v3029_v59 = vadd.f32 %v3028_v7, %v3027_v54  ;;  %v2929_v60 = vadd.f32 %v2928_v56, %v2927_v12  ;;  %v2930_v63 = vsel %vm2910_vm4, %v4448_v29, 0.0  ;;  %v2992_v0 = vmul.f32 %v4450_v5, %v4450_v5  ;;  %3223 = vst.msk [vmem:[%s5430_s12 + $0x2c] sm:$0xf] %vm3211_vm3, %v3991_v55 }
 0x1ad   : > { %v4414_v58 = vpop.f32.mrb[12].mxu0  ;;  %v3030_v36 = vsel %vm2910_vm4, %v2990_v57, 0.0  ;;  %3221 = vst.msk [vmem:[%s5430_s12 + $0x24] sm:$0xf] %vm3211_vm3, %v3989_v35  ;;  %v3032_v6 = vsel %vm2910_vm4, %v2991_v53, 0.0  ;;  %v2932_v8 = vsel %vm2910_vm4, %v4450_v5, 0.0 }
 0x1ae   : > { %v4452_v61 = vadd.f32 %v4414_v58, %v5418_v37  ;;  %v2799_v62 = vpop.f32.mrb[13].mxu0  ;;  %v2931_v37 = vadd.f32 %v2930_v63, %v2929_v60  ;;  %v3031_v9 = vadd.f32 %v3030_v36, %v3029_v59 }
 0x1af   : > { %v4453_v2 = vadd.f32 %v2799_v62, %v5420_v38  ;;  %v4415_v4 = vpop.f32.mrb[14].mxu0  ;;  %v3034_v38 = vsel %vm2910_vm4, %v2992_v0, 0.0 }
 0x1b0   : > { %v2802_v10 = vpop.f32.mrb[15].mxu0  ;;  %v3994_v11 = vpack.c.bf16 %v4452_v61, %v4452_v61  ;;  %v3033_v16 = vadd.f32 %v3032_v6, %v3031_v9  ;;  %v2933_v17 = vadd.f32 %v2932_v8, %v2931_v37  ;;  %v4454_v18 = vadd.f32 %v4415_v4, %v5422_v39 }
 0x1b1   : > { %v2934_v13 = vsel %vm2910_vm4, %v4453_v2, 0.0  ;;  %v2993_v14 = vmul.f32 %v4453_v2, %v4453_v2  ;;  %v3992_v15 = vpack.c.bf16 %v4453_v2, %v4453_v2  ;;  %v4455_v20 = vadd.f32 %v2802_v10, %v5424_v40 }
 0x1b2   : > { %3226 = vst.msk [vmem:[%s5430_s12 + $0x38] sm:$0xf] %vm3211_vm3, %v3994_v11  ;;  %v2995_v21 = vmul.f32 %v4452_v61, %v4452_v61  ;;  %v2935_v22 = vadd.f32 %v2934_v13, %v2933_v17  ;;  %v3035_v23 = vadd.f32 %v3034_v38, %v3033_v16  ;;  %v3995_v25 = vpack.c.bf16 %v4454_v18, %v4454_v18 }
 0x1b3   : > { %v3036_v19 = vsel %vm2910_vm4, %v2993_v14, 0.0  ;;  %3224 = vst.msk [vmem:[%s5430_s12 + $0x30] sm:$0xf] %vm3211_vm3, %v3992_v15  ;;  %v2936_v26 = vsel %vm2910_vm4, %v4455_v20, 0.0  ;;  %v2994_v39 = vmul.f32 %v4455_v20, %v4455_v20  ;;  %v3993_v27 = vpack.c.bf16 %v4455_v20, %v4455_v20 }
 0x1b4   : > { %v3037_v30 = vadd.f32 %v3036_v19, %v3035_v23  ;;  %v2937_v31 = vadd.f32 %v2936_v26, %v2935_v22  ;;  %v2938_v40 = vsel %vm2910_vm4, %v4452_v61, 0.0  ;;  %v2996_v43 = vmul.f32 %v4454_v18, %v4454_v18  ;;  %3227 = vst.msk [vmem:[%s5430_s12 + $0x3c] sm:$0xf] %vm3211_vm3, %v3995_v25 }
 0x1b5   : > { %v4298_v24 = vpop.f32.mrb[16].mxu1  ;;  %v4418_v28 = vpop.f32.mrb[16].mxu0  ;;  %v3038_v44 = vsel %vm2910_vm4, %v2994_v39, 0.0  ;;  %3225 = vst.msk [vmem:[%s5430_s12 + $0x34] sm:$0xf] %vm3211_vm3, %v3993_v27  ;;  %v3040_v33 = vsel %vm2910_vm4, %v2995_v21, 0.0 }
 0x1b6   : > { %v1645_v29 = vpop.f32.mrb[17].mxu1  ;;  %v4456_v32 = vadd.f32 %v4418_v28, %v4298_v24  ;;  %v2815_v41 = vpop.f32.mrb[17].mxu0  ;;  %v2940_v48 = vsel %vm2910_vm4, %v4454_v18, 0.0  ;;  %v2939_v49 = vadd.f32 %v2938_v40, %v2937_v31  ;;  %v3039_v1 = vadd.f32 %v3038_v44, %v3037_v30 }
 0x1b7   : > { %v4299_v42 = vpop.f32.mrb[18].mxu1  ;;  %v4457_v45 = vadd.f32 %v2815_v41, %v1645_v29  ;;  %v4419_v46 = vpop.f32.mrb[18].mxu0  ;;  %v3042_v12 = vsel %vm2910_vm4, %v2996_v43, 0.0 }
 0x1b8   : > { %v1648_v47 = vpop.f32.mrb[19].mxu1  ;;  %v2818_v3 = vpop.f32.mrb[19].mxu0  ;;  %v3998_v50 = vpack.c.bf16 %v4456_v32, %v4456_v32  ;;  %v3041_v7 = vadd.f32 %v3040_v33, %v3039_v1  ;;  %v2941_v52 = vadd.f32 %v2940_v48, %v2939_v49  ;;  %v4458_v53 = vadd.f32 %v4419_v46, %v4299_v42 }
 0x1b9   : > { %v2942_v51 = vsel %vm2910_vm4, %v4457_v45, 0.0  ;;  %v2997_v5 = vmul.f32 %v4457_v45, %v4457_v45  ;;  %v3996_v34 = vpack.c.bf16 %v4457_v45, %v4457_v45  ;;  %v4459_v55 = vadd.f32 %v2818_v3, %v1648_v47 }
 0x1ba   : > { %3230 = vst.msk [vmem:[%s5430_s12 + $0x48] sm:$0xf] %vm3211_vm3, %v3998_v50  ;;  %v2999_v56 = vmul.f32 %v4456_v32, %v4456_v32  ;;  %v2943_v57 = vadd.f32 %v2942_v51, %v2941_v52  ;;  %v3043_v35 = vadd.f32 %v3042_v12, %v3041_v7  ;;  %v3999_v59 = vpack.c.bf16 %v4458_v53, %v4458_v53 }
 0x1bb   : > { %v3044_v54 = vsel %vm2910_vm4, %v2997_v5, 0.0  ;;  %3228 = vst.msk [vmem:[%s5430_s12 + $0x40] sm:$0xf] %vm3211_vm3, %v3996_v34  ;;  %v2944_v60 = vsel %vm2910_vm4, %v4459_v55, 0.0  ;;  %v2998_v61 = vmul.f32 %v4459_v55, %v4459_v55  ;;  %v3997_v62 = vpack.c.bf16 %v4459_v55, %v4459_v55 }
 0x1bc   : > { %v3045_v36 = vadd.f32 %v3044_v54, %v3043_v35  ;;  %v2945_v2 = vadd.f32 %v2944_v60, %v2943_v57  ;;  %v2946_v37 = vsel %vm2910_vm4, %v4456_v32, 0.0  ;;  %v3000_v9 = vmul.f32 %v4458_v53, %v4458_v53  ;;  %3231 = vst.msk [vmem:[%s5430_s12 + $0x4c] sm:$0xf] %vm3211_vm3, %v3999_v59 }
 0x1bd   : > { %v4302_v58 = vpop.f32.mrb[20].mxu1  ;;  %v4422_v63 = vpop.f32.mrb[20].mxu0  ;;  %v3046_v10 = vsel %vm2910_vm4, %v2998_v61, 0.0  ;;  %3229 = vst.msk [vmem:[%s5430_s12 + $0x44] sm:$0xf] %vm3211_vm3, %v3997_v62  ;;  %v3048_v15 = vsel %vm2910_vm4, %v2999_v56, 0.0 }
 0x1be   : > { %v1661_v0 = vpop.f32.mrb[21].mxu1  ;;  %v4460_v4 = vadd.f32 %v4422_v63, %v4302_v58  ;;  %v2831_v6 = vpop.f32.mrb[21].mxu0  ;;  %v2948_v16 = vsel %vm2910_vm4, %v4458_v53, 0.0  ;;  %v2947_v17 = vadd.f32 %v2946_v37, %v2945_v2  ;;  %v3047_v18 = vadd.f32 %v3046_v10, %v3045_v36 }
 0x1bf   : > { %v4303_v8 = vpop.f32.mrb[22].mxu1  ;;  %v4461_v11 = vadd.f32 %v2831_v6, %v1661_v0  ;;  %v4423_v13 = vpop.f32.mrb[22].mxu0  ;;  %v3050_v26 = vsel %vm2910_vm4, %v3000_v9, 0.0 }
 0x1c0   : > { %v1664_v14 = vpop.f32.mrb[23].mxu1  ;;  %v2834_v38 = vpop.f32.mrb[23].mxu0  ;;  %v4002_v19 = vpack.c.bf16 %v4460_v4, %v4460_v4  ;;  %v3049_v23 = vadd.f32 %v3048_v15, %v3047_v18  ;;  %v2949_v24 = vadd.f32 %v2948_v16, %v2947_v17  ;;  %v4462_v25 = vadd.f32 %v4423_v13, %v4303_v8 }
 0x1c1   : > { %v2950_v20 = vsel %vm2910_vm4, %v4461_v11, 0.0  ;;  %v3001_v21 = vmul.f32 %v4461_v11, %v4461_v11  ;;  %v4000_v22 = vpack.c.bf16 %v4461_v11, %v4461_v11  ;;  %v4463_v27 = vadd.f32 %v2834_v38, %v1664_v14 }
 0x1c2   : > { %3234 = vst.msk [vmem:[%s5430_s12 + $0x58] sm:$0xf] %vm3211_vm3, %v4002_v19  ;;  %v3003_v28 = vmul.f32 %v4460_v4, %v4460_v4  ;;  %v2951_v29 = vadd.f32 %v2950_v20, %v2949_v24  ;;  %v3051_v30 = vadd.f32 %v3050_v26, %v3049_v23  ;;  %v4003_v32 = vpack.c.bf16 %v4462_v25, %v4462_v25 }
 0x1c3   : > { %v3052_v39 = vsel %vm2910_vm4, %v3001_v21, 0.0  ;;  %3232 = vst.msk [vmem:[%s5430_s12 + $0x50] sm:$0xf] %vm3211_vm3, %v4000_v22  ;;  %v2952_v41 = vsel %vm2910_vm4, %v4463_v27, 0.0  ;;  %v3002_v42 = vmul.f32 %v4463_v27, %v4463_v27  ;;  %v4001_v40 = vpack.c.bf16 %v4463_v27, %v4463_v27 }
 0x1c4   : > { %v3053_v45 = vadd.f32 %v3052_v39, %v3051_v30  ;;  %v2953_v46 = vadd.f32 %v2952_v41, %v2951_v29  ;;  %v2954_v49 = vsel %vm2910_vm4, %v4460_v4, 0.0  ;;  %v3004_v1 = vmul.f32 %v4462_v25, %v4462_v25  ;;  %3235 = vst.msk [vmem:[%s5430_s12 + $0x5c] sm:$0xf] %vm3211_vm3, %v4003_v32 }
 0x1c5   : > { %v4306_v31 = vpop.f32.mrb[24].mxu1  ;;  %v4426_v43 = vpop.f32.mrb[24].mxu0  ;;  %v3054_v3 = vsel %vm2910_vm4, %v3002_v42, 0.0  ;;  %3233 = vst.msk [vmem:[%s5430_s12 + $0x54] sm:$0xf] %vm3211_vm3, %v4001_v40  ;;  %v3056_v34 = vsel %vm2910_vm4, %v3003_v28, 0.0 }
 0x1c6   : > { %v1677_v44 = vpop.f32.mrb[25].mxu1  ;;  %v4464_v47 = vadd.f32 %v4426_v43, %v4306_v31  ;;  %v2847_v33 = vpop.f32.mrb[25].mxu0  ;;  %v2956_v7 = vsel %vm2910_vm4, %v4462_v25, 0.0  ;;  %v2955_v52 = vadd.f32 %v2954_v49, %v2953_v46  ;;  %v3055_v53 = vadd.f32 %v3054_v3, %v3053_v45 }
 0x1c7   : > { %v4307_v48 = vpop.f32.mrb[26].mxu1  ;;  %v4465_v50 = vadd.f32 %v2847_v33, %v1677_v44  ;;  %v4427_v51 = vpop.f32.mrb[26].mxu0  ;;  %v3058_v60 = vsel %vm2910_vm4, %v3004_v1, 0.0 }
 0x1c8   : > { %v1680_v5 = vpop.f32.mrb[27].mxu1  ;;  %v2850_v12 = vpop.f32.mrb[27].mxu0  ;;  %v4006_v54 = vpack.c.bf16 %v4464_v47, %v4464_v47  ;;  %v3057_v35 = vadd.f32 %v3056_v34, %v3055_v53  ;;  %v2957_v58 = vadd.f32 %v2956_v7, %v2955_v52  ;;  %v4466_v59 = vadd.f32 %v4427_v51, %v4307_v48 }
 0x1c9   : > { %v2958_v55 = vsel %vm2910_vm4, %v4465_v50, 0.0  ;;  %v3005_v56 = vmul.f32 %v4465_v50, %v4465_v50  ;;  %v4004_v57 = vpack.c.bf16 %v4465_v50, %v4465_v50  ;;  %v4467_v62 = vadd.f32 %v2850_v12, %v1680_v5 }
 0x1ca   : > { %3238 = vst.msk [vmem:[%s5430_s12 + $0x68] sm:$0xf] %vm3211_vm3, %v4006_v54  ;;  %v3007_v63 = vmul.f32 %v4464_v47, %v4464_v47  ;;  %v2959_v0 = vadd.f32 %v2958_v55, %v2957_v58  ;;  %v3059_v36 = vadd.f32 %v3058_v60, %v3057_v35  ;;  %v4007_v4 = vpack.c.bf16 %v4466_v59, %v4466_v59 }
 0x1cb   : > { %v3060_v61 = vsel %vm2910_vm4, %v3005_v56, 0.0  ;;  %3236 = vst.msk [vmem:[%s5430_s12 + $0x60] sm:$0xf] %vm3211_vm3, %v4004_v57  ;;  %v2960_v6 = vsel %vm2910_vm4, %v4467_v62, 0.0  ;;  %v3006_v8 = vmul.f32 %v4467_v62, %v4467_v62  ;;  %v4005_v37 = vpack.c.bf16 %v4467_v62, %v4467_v62 }
 0x1cc   : > { %v3061_v11 = vadd.f32 %v3060_v61, %v3059_v36  ;;  %v2961_v13 = vadd.f32 %v2960_v6, %v2959_v0  ;;  %v2962_v17 = vsel %vm2910_vm4, %v4464_v47, 0.0  ;;  %v3008_v18 = vmul.f32 %v4466_v59, %v4466_v59  ;;  %3239 = vst.msk [vmem:[%s5430_s12 + $0x6c] sm:$0xf] %vm3211_vm3, %v4007_v4  ;;  %v3251_v0 = vld [vmem:[%s5401_s6] sm:$0x1] }
 0x1cd   : > { %v4310_v2 = vpop.f32.mrb[28].mxu1  ;;  %v4430_v9 = vpop.f32.mrb[28].mxu0  ;;  %v3062_v38 = vsel %vm2910_vm4, %v3006_v8, 0.0  ;;  %3237 = vst.msk [vmem:[%s5430_s12 + $0x64] sm:$0xf] %vm3211_vm3, %v4005_v37  ;;  %v3064_v22 = vsel %vm2910_vm4, %v3007_v63, 0.0 }
 0x1ce   : > { %v1693_v10 = vpop.f32.mrb[29].mxu1  ;;  %v4468_v14 = vadd.f32 %v4430_v9, %v4310_v2  ;;  %v2863_v15 = vpop.f32.mrb[29].mxu0  ;;  %v2964_v23 = vsel %vm2910_vm4, %v4466_v59, 0.0  ;;  %v2963_v24 = vadd.f32 %v2962_v17, %v2961_v13  ;;  %v3063_v25 = vadd.f32 %v3062_v38, %v3061_v11  ;;  %v3255_v4 = vld [vmem:[%s5406_s8] sm:$0x1] }
 0x1cf   : > { %v4311_v16 = vpop.f32.mrb[30].mxu1  ;;  %v4469_v19 = vadd.f32 %v2863_v15, %v1693_v10  ;;  %v4431_v20 = vpop.f32.mrb[30].mxu0  ;;  %v3066_v41 = vsel %vm2910_vm4, %v3008_v18, 0.0 }
 0x1d0   : > { %v1696_v21 = vpop.f32.mrb[31].mxu1  ;;  %v2866_v26 = vpop.f32.mrb[31].mxu0  ;;  %v4010_v39 = vpack.c.bf16 %v4468_v14, %v4468_v14  ;;  %v3065_v30 = vadd.f32 %v3064_v22, %v3063_v25  ;;  %v2965_v31 = vadd.f32 %v2964_v23, %v2963_v24  ;;  %v4470_v32 = vadd.f32 %v4431_v20, %v4311_v16 }
 0x1d1   : > { %v2966_v27 = vsel %vm2910_vm4, %v4469_v19, 0.0  ;;  %v3009_v28 = vmul.f32 %v4469_v19, %v4469_v19  ;;  %v4008_v29 = vpack.c.bf16 %v4469_v19, %v4469_v19  ;;  %v4471_v40 = vadd.f32 %v2866_v26, %v1696_v21 }
 0x1d2   : > { %3242 = vst.msk [vmem:[%s5430_s12 + $0x78] sm:$0xf] %vm3211_vm3, %v4010_v39  ;;  %v3011_v43 = vmul.f32 %v4468_v14, %v4468_v14  ;;  %v2967_v44 = vadd.f32 %v2966_v27, %v2965_v31  ;;  %v3067_v45 = vadd.f32 %v3066_v41, %v3065_v30  ;;  %v4011_v46 = vpack.c.bf16 %v4470_v32, %v4470_v32 }
 0x1d3   : > { %v3068_v42 = vsel %vm2910_vm4, %v3009_v28, 0.0  ;;  %3240 = vst.msk [vmem:[%s5430_s12 + $0x70] sm:$0xf] %vm3211_vm3, %v4008_v29  ;;  %v2968_v47 = vsel %vm2910_vm4, %v4471_v40, 0.0  ;;  %v3010_v33 = vmul.f32 %v4471_v40, %v4471_v40  ;;  %v4009_v48 = vpack.c.bf16 %v4471_v40, %v4471_v40 }
 0x1d4   : > { %v3069_v49 = vadd.f32 %v3068_v42, %v3067_v45  ;;  %v2969_v1 = vadd.f32 %v2968_v47, %v2967_v44  ;;  %v2970_v3 = vsel %vm2910_vm4, %v4468_v14, 0.0  ;;  %v3012_v50 = vmul.f32 %v4470_v32, %v4470_v32  ;;  %3243 = vst.msk [vmem:[%s5430_s12 + $0x7c] sm:$0xf] %vm3211_vm3, %v4011_v46 }
 0x1d5   : > { %v3070_v51 = vsel %vm2910_vm4, %v3010_v33, 0.0  ;;  %3241 = vst.msk [vmem:[%s5430_s12 + $0x74] sm:$0xf] %vm3211_vm3, %v4009_v48  ;;  %v3072_v7 = vsel %vm2910_vm4, %v3011_v43, 0.0  ;;  %v2972_v52 = vsel %vm2910_vm4, %v4470_v32, 0.0  ;;  %s4848_s12 = scalar_lea.vmem %s4847_s10, 32 }
 0x1d6   : > { %v2971_v5 = vadd.f32 %v2970_v3, %v2969_v1  ;;  %v3071_v34 = vadd.f32 %v3070_v51, %v3069_v49  ;;  %v3074_v54 = vsel %vm2910_vm4, %v3012_v50, 0.0  ;;  %p4850_p2 = scmp.lt.s32.totalorder %s4848_s12, %s4842_s7 }
 0x1d8   : > { %v2973_v53 = vadd.f32 %v2972_v52, %v2971_v5  ;;  %v3073_v12 = vadd.f32 %v3072_v7, %v3071_v34  ;;  %p4851_p3 = por %p4850_p2, %p4849_p1 }
 0x1da   : > { %v2974_v55 = vrot.slane %v2973_v53, 4  ;;  %v3075_v56 = vadd.f32 %v3074_v54, %v3073_v12  ;;  %p4852_p5 = pnand %p4851_p3, %p4845_p0 }
 0x1dc   : > { %v2975_v57 = vadd.f32 %v2974_v55, %v2973_v53  ;;  %v3076_v35 = vrot.slane %v3075_v56, 4 }
 0x1de   : > { %v2976_v58 = vrot.slane %v2975_v57, 2  ;;  %v3077_v59 = vadd.f32 %v3076_v35, %v3075_v56 }
 0x1e0   : > { %v2977_v60 = vadd.f32 %v2976_v58, %v2975_v57  ;;  %v3078_v61 = vrot.slane %v3077_v59, 2 }
 0x1e2   : > { %v2978_v62 = vrot.slane %v2977_v60, 1  ;;  %v3079_v63 = vadd.f32 %v3078_v61, %v3077_v59 }
 0x1e4   : > { %v2979_v36 = vadd.f32 %v2978_v62, %v2977_v60  ;;  %v3080_v2 = vrot.slane %v3079_v63, 1 }
 0x1e6   : > { %v3252_v6 = vadd.f32 %v3251_v0, %v2979_v36  ;;  %v3081_v8 = vadd.f32 %v3080_v2, %v3079_v63 }
 0x1e8   : > { %3254 = vst.msk [vmem:[%s5401_s6] sm:$0x1] %vm3248_vm2, %v3252_v6  ;;  %v3256_v37 = vadd.f32 %v3255_v4, %v3081_v8 }
 0x1e9   : > { %4855 = shalt.err (!%p4852_p5)
}
 0x1ea   : > { %s4856_s6 = scalar_lea.hbm %s5576_s24, 16  ;;  %s4860_s22 = scalar_lea.hbm %s5660_s3, 32 }
 0x1eb   : > { %p4857_p6 = scmp.ne.s32.totalorder %s5576_s24, %s4856_s6  ;;  %p4861_p10 = scmp.lt.u32.totalorder %s5576_s24, %s5660_s3 }
 0x1ec   : > { %p4862_p11 = scmp.lt.u32.totalorder %s4860_s22, %s4856_s6  ;;  %p4864_p13 = scmp.lt.u32.totalorder %s4856_s6, %s5576_s24 }
 0x1ed   : > { %p4858_p7 = pnand %p4857_p6, %p5022_p4 }
 0x1ee   : > { %p4863_p12 = por %p4862_p11, %p4861_p10 }
 0x1ef   : > { %p4859_p9 = pneg %p4858_p7 }
 0x1f0   : > { %p4865_p0 = por %p4864_p13, %p4863_p12 }
 0x1f2   : > { %p4866_p1 = pnand %p4865_p0, %p4859_p9 }
 0x1f4   : > { %4869 = shalt.err (!%p4866_p1)
}
 0x1f5   : > { %4641 = dma.vmem_to_hbm [thread:$0]  (%p5022_p4), %s5578_s13, 16, %s5576_s24, %s3269_s30   ;;  %3257 = vst.msk [vmem:[%s5406_s8] sm:$0x1] %vm3248_vm2, %v3256_v37 }
 0x1f6   : > { %s3273_s7 = scalar_lea.sflag [#allocation5], %s5398_s5  ;;  %s4870_s9 = scalar_lea.vmem %s5587_s14, 16 }
 0x1f7   : > { %p4871_p2 = scmp.ne.s32.totalorder %s5587_s14, %s4870_s9  ;;  %s4956_s10 = smov [#allocation4]  }
 0x1f8   : > { %s4874_s12 = sshll.u32 %s4956_s10, 4  ;;  %s4875_s12 = int_to_ptr.vmem [resolvable:$false] %s4874_s12 }
 0x1f9   : > { %p4872_p3 = pnand %p4871_p2, %p5022_p4  ;;  %s4876_s6 = scalar_lea.vmem %s4875_s12, 32 }
 0x1fa   : > { %p4877_p6 = scmp.lt.s32.totalorder %s5587_s14, %s4875_s12  ;;  %p4878_p7 = scmp.lt.s32.totalorder %s4876_s6, %s4870_s9 }
 0x1fb   : > { %p4873_p5 = pneg %p4872_p3 }
 0x1fc   : > { %p4879_p9 = por %p4878_p7, %p4877_p6 }
 0x1fe   : > { %p4880_p10 = pnand %p4879_p9, %p4873_p5 }
 0x200   : > { %4883 = shalt.err (!%p4880_p10)
}
 0x201   : > { %s4884_s5 = scalar_lea.hbm %s5585_s29, 16  ;;  %s4888_s24 = scalar_lea.hbm %s5661_s4, 32 }
 0x202   : > { %p4885_p11 = scmp.ne.s32.totalorder %s5585_s29, %s4884_s5  ;;  %p4889_p0 = scmp.lt.u32.totalorder %s5585_s29, %s5661_s4 }
 0x203   : > { %p4890_p1 = scmp.lt.u32.totalorder %s4888_s24, %s4884_s5  ;;  %p4892_p3 = scmp.lt.u32.totalorder %s4884_s5, %s5585_s29 }
 0x204   : > { %p4886_p12 = pnand %p4885_p11, %p5022_p4 }
 0x205   : > { %p4891_p2 = por %p4890_p1, %p4889_p0 }
 0x206   : > { %p4887_p13 = pneg %p4886_p12 }
 0x207   : > { %p4893_p5 = por %p4892_p3, %p4891_p2 }
 0x209   : > { %p4894_p6 = pnand %p4893_p5, %p4887_p13 }
 0x20b   : > { %4897 = shalt.err (!%p4894_p6)
}
 0x20c   : > { %4642 = dma.vmem_to_hbm [thread:$0]  (%p5022_p4), %s5587_s14, 16, %s5585_s29, %s3273_s7  }
 0x20d PF: > { %p4652_p7 = scmp.ge.s32.totalorder %s4952_s20, 2  ;;  %s3327_s21 = sand.u32 1, %s4932_s15  }
 0x20e   : > { %s3328_s22 = scalar_lea.sflag [#allocation3], %s3327_s21 }
 0x20f   : > { %p4646_p9 = pnand %p4652_p7, %p5029_p8 }
 0x211   : > { %4923 = dma.done.wait (!%p4646_p9), %s3328_s22, 16  }
 0x212   : > { %4925 = vsyncadd (!%p4646_p9), %s3328_s22, 4294967280  ;;  %s3336_s18 = scalar_lea.sflag [#allocation5], %s3327_s21 }
 0x213   : > { %4927 = dma.done.wait (!%p4646_p9), %s3336_s18, 16  }
 0x214   : > { %4929 = vsyncadd (!%p4646_p9), %s3336_s18, 4294967280  ;;  %s21_s20 = sadd.s32 1, %s4952_s20   ;;  %s5664_s15 = smov %s4936_s16 }
 0x215   : > { %p18_p10 = scmp.ge.s32.totalorder %s21_s20, 4   ;;  %s5665_s16 = smov %s4940_s17 }
 0x216   : > { %s5666_s17 = smov %s5035_s28  ;;  %s5667_s18 = smov %s4948_s19 }
 0x217   : > { %s5668_s19 = smov %s5670_s23  ;;  %20 = sbr.rel (!%p18_p10) target bundleno = 6 (0x6), region = 109 }
 0x21e   :  { %3340 = vsyncpa [#allocation3], 1 }
 0x21f   :  { %3342 = vsyncpa [#allocation3 + $0x1], 1 }
 0x220   :  { %3343 = vsyncpa [#allocation5], 1 }
 0x221   :  { %3345 = vsyncpa [#allocation5 + $0x1], 1 }

</bundles_post_ra>
